<compile_context>
chip_gen: v7x
topology: tpu7x:2x2x1
jax: 0.10.0
libtpu: 0.0.40
codegen_flags: <defaults>
</compile_context>

<pallas_src>
import functools

import jax
import jax.numpy as jnp
from jax import lax
from jax.experimental import pallas as pl
from jax.experimental.pallas import tpu as pltpu

EPS = 1e-5  # PyTorch InstanceNorm2d default eps


def _smooth_dilated_resblock_kernel(
    x_ref, mask_ref, wsh1_ref, w1_ref, g1_ref, b1_ref,
    wsh2_ref, w2_ref, g2_ref, b2_ref,
    o_ref, buf,
    *, C, H, W, P, dilation, group, k1):
  """One batch element: pre_conv1 -> conv1 -> IN+ReLU -> pre_conv2 -> conv2 -> IN -> ReLU."""
  Hp, Wp = H + 2 * P, W + 2 * P
  F = Hp * Wp              # flattened zero-padded frame
  M = P * (Wp + 1)         # flat margin = max |tap shift|
  p1 = (k1 - 1) // 2
  inv_hw = 1.0 / float(H * W)

  mask = mask_ref[...]     # (1, F): 1.0 on interior pixels, 0.0 on the halo

  # Load this batch element; zero halo and zero margins come pre-built from
  # the wrapper, so no in-kernel buffer zeroing is needed.
  buf[...] = x_ref[0]

  def tap(dh, dw, c0=0, c1=C):
    # Contiguous lane slice s.t. view[:, p] == frame[:, p + dh*Wp + dw].
    s = M + dh * Wp + dw
    return buf[c0:c1, s:s + F]

  def share_conv_inplace(wsh_ref):
    # ShareSepConv: one shared (k1, k1) depthwise kernel for every channel,
    # vectorized over the whole channel stack (VPU), k1*k1 taps total.
    acc = jnp.zeros((C, F), jnp.float32)
    for kh in range(k1):
      for kw in range(k1):
        acc = acc + wsh_ref[kh * k1 + kw] * tap(kh - p1, kw - p1)
    # Re-zero the halo so the next conv sees proper zero padding.
    buf[:, M:M + F] = acc * mask

  def conv3x3(w_ref, dil, pad, groups):
    # 3x3 conv (optionally dilated / grouped), no bias, as per-tap GEMMs on
    # the MXU.  The 9 shifted views are hoisted out of all channel loops.
    cg = C // groups
    outs = []
    for g in range(groups):
      acc = jnp.zeros((cg, F), jnp.float32)
      for kh in range(3):
        for kw in range(3):
          t = kh * 3 + kw
          xs = tap(kh * dil - pad, kw * dil - pad, g * cg, (g + 1) * cg)
          acc = acc + jnp.dot(w_ref[t, g * cg:(g + 1) * cg, :], xs,
                              preferred_element_type=jnp.float32)
      outs.append(acc)
    return outs[0] if groups == 1 else jnp.concatenate(outs, axis=0)

  def inorm_relu(y, g_ref, b_ref):
    # InstanceNorm2d(affine=True) + ReLU, masked to interior pixels,
    # vectorized over channels; rsqrt on the EUP, affine folded into one FMA.
    m = jnp.sum(y * mask, axis=1, keepdims=True) * inv_hw
    var = jnp.sum(jnp.square(y - m) * mask, axis=1, keepdims=True) * inv_hw
    scale = g_ref[...] * lax.rsqrt(var + EPS)
    bias = b_ref[...] - m * scale
    return jnp.maximum(y * scale + bias, 0.0)

  # ---- stage 1: relu(norm1(conv1(pre_conv1(x)))) -> back into buf ----
  share_conv_inplace(wsh1_ref)
  y = inorm_relu(conv3x3(w1_ref, dilation, dilation, group), g1_ref, b1_ref)
  buf[:, M:M + F] = y * mask

  # ---- stage 2: relu(norm2(conv2(pre_conv2(y)))) -> lane-dense store ----
  share_conv_inplace(wsh2_ref)
  o_ref[0] = inorm_relu(conv3x3(w2_ref, 1, 1, 1), g2_ref, b2_ref)


def smooth_dilated_resblock(x, params, *, dilation, group=1):
  N, C, H, W = x.shape
  k1 = 2 * dilation - 1
  P = max(dilation, 1)          # halo radius covers share-conv, conv1, conv2
  Hp, Wp = H + 2 * P, W + 2 * P
  F = Hp * Wp
  M = P * (Wp + 1)
  L = F + 2 * M
  cg = C // group

  # Lane-dense flat activation layout:
  #   [ M zeros | flattened (Hp, Wp) zero-padded image | M zeros ]
  xp = jnp.pad(x.astype(jnp.float32), ((0, 0), (0, 0), (P, P), (P, P)))
  x_flat = jnp.pad(xp.reshape(N, C, F), ((0, 0), (0, 0), (M, M)))

  # Interior mask (1.0 inside the original HxW image, 0.0 on the halo).
  rows = jnp.arange(Hp)[:, None]
  cols = jnp.arange(Wp)[None, :]
  mask = (((rows >= P) & (rows < P + H) & (cols >= P) & (cols < P + W))
          .astype(jnp.float32).reshape(1, F))

  # Tap-major conv weights (9, C_out, C_in_per_group) -> VMEM for the MXU.
  w1 = params["w1"].astype(jnp.float32).transpose(2, 3, 0, 1).reshape(9, C, cg)
  w2 = params["w2"].astype(jnp.float32).transpose(2, 3, 0, 1).reshape(9, C, C)
  g1 = params["g1"].astype(jnp.float32).reshape(C, 1)
  b1 = params["b1"].astype(jnp.float32).reshape(C, 1)
  g2 = params["g2"].astype(jnp.float32).reshape(C, 1)
  b2 = params["b2"].astype(jnp.float32).reshape(C, 1)
  wsh1 = params["wsh1"].astype(jnp.float32).reshape(-1)
  wsh2 = params["wsh2"].astype(jnp.float32).reshape(-1)

  kernel = functools.partial(
      _smooth_dilated_resblock_kernel,
      C=C, H=H, W=W, P=P, dilation=dilation, group=group, k1=k1)

  smem = pl.BlockSpec(memory_space=pltpu.MemorySpace.SMEM)

  def vmem_full(shape):
    return pl.BlockSpec(shape, lambda n: (0,) * len(shape))

  x_spec = pl.BlockSpec((1, C, L), lambda n: (n, 0, 0))
  o_spec = pl.BlockSpec((1, C, F), lambda n: (n, 0, 0))

  out = pl.pallas_call(
      kernel,
      out_shape=jax.ShapeDtypeStruct((N, C, F), jnp.float32),
      grid=(N,),
      in_specs=[x_spec,
                vmem_full((1, F)),                 # interior mask
                smem,                              # shared ShareSepConv kernel 1
                vmem_full((9, C, cg)),             # conv1 weights (tap-major)
                vmem_full((C, 1)), vmem_full((C, 1)),   # norm1 gamma / beta
                smem,                              # shared ShareSepConv kernel 2
                vmem_full((9, C, C)),              # conv2 weights (tap-major)
                vmem_full((C, 1)), vmem_full((C, 1))],  # norm2 gamma / beta
      out_specs=o_spec,
      scratch_shapes=[pltpu.VMEM((C, L), jnp.float32)],  # flat padded activations
      compiler_params=pltpu.CompilerParams(
          dimension_semantics=("parallel",),       # batch is independent
          vmem_limit_bytes=64 * 1024 * 1024),
  )(x_flat, mask, wsh1, w1, g1, b1, wsh2, w2, g2, b2)

  # Drop the halo (layout plumbing done by XLA outside the kernel).
  return out.reshape(N, C, Hp, Wp)[:, :, P:P + H, P:P + W]


# ---------------- pure-JAX reference (for correctness check) ----------------
def reference(x, p, *, dilation, group):
  N, C, H, W = x.shape
  k1 = 2 * dilation - 1
  p1 = (k1 - 1) // 2
  dn = ('NCHW', 'OIHW', 'NCHW')

  def share(y, wk):
    w = jnp.broadcast_to(wk.reshape(1, 1, k1, k1), (C, 1, k1, k1))
    return lax.conv_general_dilated(
        y, w, (1, 1), [(p1, p1), (p1, p1)],
        dimension_numbers=dn, feature_group_count=C)

  def inorm(y, g, b):
    m = y.mean(axis=(2, 3), keepdims=True)
    v = ((y - m) ** 2).mean(axis=(2, 3), keepdims=True)
    return (y - m) / jnp.sqrt(v + EPS) * g[None, :, None, None] \
        + b[None, :, None, None]

  y = share(x, p["wsh1"])
  y = lax.conv_general_dilated(
      y, p["w1"], (1, 1), [(dilation, dilation), (dilation, dilation)],
      rhs_dilation=(dilation, dilation),
      dimension_numbers=dn, feature_group_count=group)
  y = jax.nn.relu(inorm(y, p["g1"], p["b1"]))
  y = share(y, p["wsh2"])
  y = lax.conv_general_dilated(
      y, p["w2"], (1, 1), [(1, 1), (1, 1)], dimension_numbers=dn)
  return jax.nn.relu(inorm(y, p["g2"], p["b2"]))


if __name__ == "__main__":
  N, C, H, W = 2, 4, 16, 16
  key = jax.random.PRNGKey(0)

  # (dilation, group): res2 / res4 of MI_Net, plus a grouped-conv1 variant.
  for dilation, group in [(2, 1), (4, 1), (2, 2)]:
    k1 = 2 * dilation - 1
    key, kx, kw1, kw2, kg1, kb1, kg2, kb2 = jax.random.split(key, 8)
    x = jax.random.normal(kx, (N, C, H, W), dtype=jnp.float32)

    # ShareSepConv weight: delta at the kernel center (as in __init__).
    wsh = jnp.zeros((k1, k1), jnp.float32).at[(k1 - 1) // 2, (k1 - 1) // 2].set(1.0)

    params = dict(
        wsh1=wsh, wsh2=wsh,
        w1=0.1 * jax.random.normal(kw1, (C, C // group, 3, 3), jnp.float32),
        w2=0.1 * jax.random.normal(kw2, (C, C, 3, 3), jnp.float32),
        g1=1.0 + 0.1 * jax.random.normal(kg1, (C,), jnp.float32),
        b1=0.1 * jax.random.normal(kb1, (C,), jnp.float32),
        g2=1.0 + 0.1 * jax.random.normal(kg2, (C,), jnp.float32),
        b2=0.1 * jax.random.normal(kb2, (C,), jnp.float32),
    )

    out = smooth_dilated_resblock(x, params, dilation=dilation, group=group)
    out = jax.block_until_ready(out)

    ref = reference(x, params, dilation=dilation, group=group)
    assert out.shape == (N, C, H, W) and out.dtype == jnp.float32
    # Tolerance accommodates MXU default-precision f32 matmuls (which may
    # round intermediates through bf16 passes) vs. the XLA reference conv.
    assert jnp.allclose(out, ref, atol=2e-2, rtol=2e-2), (
        f"dilation={dilation} group={group}: "
        f"max abs err = {float(jnp.max(jnp.abs(out - ref)))}")

  print("KERNEL_OK")
</pallas_src>

<mosaic_0001>
module attributes {stable_mosaic.version = 11 : i64} {
  func.func @_smooth_dilated_resblock_kernel(%arg0: i32, %arg1: memref<1x4x484xf32, #tpu.memory_space<vmem>>, %arg2: memref<1x400xf32, #tpu.memory_space<vmem>>, %arg3: memref<9xf32, #tpu.memory_space<smem>>, %arg4: memref<9x4x4xf32, #tpu.memory_space<vmem>>, %arg5: memref<4x1xf32, #tpu.memory_space<vmem>>, %arg6: memref<4x1xf32, #tpu.memory_space<vmem>>, %arg7: memref<9xf32, #tpu.memory_space<smem>>, %arg8: memref<9x4x4xf32, #tpu.memory_space<vmem>>, %arg9: memref<4x1xf32, #tpu.memory_space<vmem>>, %arg10: memref<4x1xf32, #tpu.memory_space<vmem>>, %arg11: memref<1x4x400xf32, #tpu.memory_space<vmem>>, %arg12: memref<4x484xf32, #tpu.memory_space<vmem>>) attributes {dimension_semantics = [#tpu.dimension_semantics<parallel>], iteration_bounds = array<i64: 2>, scalar_prefetch = 0 : i64, scratch_operands = 1 : i64, tpu.core_type = #tpu.core_type<tc>, window_params = [{transform_indices = @transform_0, window_bounds = array<i64: 1, 4, 484>}, {pipeline_mode = #tpu.pipeline_mode<synchronous>, transform_indices = @transform_1, window_bounds = array<i64: 1, 400>}, {transform_indices = @transform_2, window_bounds = array<i64: 9>}, {pipeline_mode = #tpu.pipeline_mode<synchronous>, transform_indices = @transform_3, window_bounds = array<i64: 9, 4, 4>}, {pipeline_mode = #tpu.pipeline_mode<synchronous>, transform_indices = @transform_4, window_bounds = array<i64: 4, 1>}, {pipeline_mode = #tpu.pipeline_mode<synchronous>, transform_indices = @transform_5, window_bounds = array<i64: 4, 1>}, {transform_indices = @transform_6, window_bounds = array<i64: 9>}, {pipeline_mode = #tpu.pipeline_mode<synchronous>, transform_indices = @transform_7, window_bounds = array<i64: 9, 4, 4>}, {pipeline_mode = #tpu.pipeline_mode<synchronous>, transform_indices = @transform_8, window_bounds = array<i64: 4, 1>}, {pipeline_mode = #tpu.pipeline_mode<synchronous>, transform_indices = @transform_9, window_bounds = array<i64: 4, 1>}, {transform_indices = @transform_10, window_bounds = array<i64: 1, 4, 400>}]} {
    %c0 = arith.constant 0 : index
    %c0_0 = arith.constant 0 : index
    %0 = vector.load %arg2[%c0, %c0_0] : memref<1x400xf32, #tpu.memory_space<vmem>>, vector<1x400xf32>
    %c0_1 = arith.constant 0 : index
    %c0_2 = arith.constant 0 : index
    %c0_3 = arith.constant 0 : index
    %1 = vector.load %arg1[%c0_1, %c0_2, %c0_3] : memref<1x4x484xf32, #tpu.memory_space<vmem>>, vector<1x4x484xf32>
    %2 = vector.shape_cast %1 : vector<1x4x484xf32> to vector<4x484xf32>
    %c0_4 = arith.constant 0 : index
    %c0_5 = arith.constant 0 : index
    %3 = vector.load %arg12[%c0_4, %c0_5] : memref<4x484xf32, #tpu.memory_space<vmem>>, vector<4x484xf32>
    tpu.vector_store %arg12[%c0_4, %c0_5], %2 {strides = array<i32>} : memref<4x484xf32, #tpu.memory_space<vmem>>, vector<4x484xf32>,
    %cst = arith.constant 0.000000e+00 : f32
    %4 = vector.broadcast %cst : f32 to vector<4x400xf32>
    %c0_6 = arith.constant 0 : index
    %5 = memref.load %arg3[%c0_6] : memref<9xf32, #tpu.memory_space<smem>>
    %c0_7 = arith.constant 0 : index
    %c21 = arith.constant 21 : index
    %6 = vector.load %arg12[%c0_7, %c21] : memref<4x484xf32, #tpu.memory_space<vmem>>, vector<4x400xf32>
    %7 = vector.broadcast %5 : f32 to vector<4x400xf32>
    %8 = arith.mulf %7, %6 : vector<4x400xf32>
    %9 = arith.addf %4, %8 : vector<4x400xf32>
    %c1 = arith.constant 1 : index
    %10 = memref.load %arg3[%c1] : memref<9xf32, #tpu.memory_space<smem>>
    %c0_8 = arith.constant 0 : index
    %c22 = arith.constant 22 : index
    %11 = vector.load %arg12[%c0_8, %c22] : memref<4x484xf32, #tpu.memory_space<vmem>>, vector<4x400xf32>
    %12 = vector.broadcast %10 : f32 to vector<4x400xf32>
    %13 = arith.mulf %12, %11 : vector<4x400xf32>
    %14 = arith.addf %9, %13 : vector<4x400xf32>
    %c2 = arith.constant 2 : index
    %15 = memref.load %arg3[%c2] : memref<9xf32, #tpu.memory_space<smem>>
    %c0_9 = arith.constant 0 : index
    %c23 = arith.constant 23 : index
    %16 = vector.load %arg12[%c0_9, %c23] : memref<4x484xf32, #tpu.memory_space<vmem>>, vector<4x400xf32>
    %17 = vector.broadcast %15 : f32 to vector<4x400xf32>
    %18 = arith.mulf %17, %16 : vector<4x400xf32>
    %19 = arith.addf %14, %18 : vector<4x400xf32>
    %c3 = arith.constant 3 : index
    %20 = memref.load %arg3[%c3] : memref<9xf32, #tpu.memory_space<smem>>
    %c0_10 = arith.constant 0 : index
    %c41 = arith.constant 41 : index
    %21 = vector.load %arg12[%c0_10, %c41] : memref<4x484xf32, #tpu.memory_space<vmem>>, vector<4x400xf32>
    %22 = vector.broadcast %20 : f32 to vector<4x400xf32>
    %23 = arith.mulf %22, %21 : vector<4x400xf32>
    %24 = arith.addf %19, %23 : vector<4x400xf32>
    %c4 = arith.constant 4 : index
    %25 = memref.load %arg3[%c4] : memref<9xf32, #tpu.memory_space<smem>>
    %c0_11 = arith.constant 0 : index
    %c42 = arith.constant 42 : index
    %26 = vector.load %arg12[%c0_11, %c42] : memref<4x484xf32, #tpu.memory_space<vmem>>, vector<4x400xf32>
    %27 = vector.broadcast %25 : f32 to vector<4x400xf32>
    %28 = arith.mulf %27, %26 : vector<4x400xf32>
    %29 = arith.addf %24, %28 : vector<4x400xf32>
    %c5 = arith.constant 5 : index
    %30 = memref.load %arg3[%c5] : memref<9xf32, #tpu.memory_space<smem>>
    %c0_12 = arith.constant 0 : index
    %c43 = arith.constant 43 : index
    %31 = vector.load %arg12[%c0_12, %c43] : memref<4x484xf32, #tpu.memory_space<vmem>>, vector<4x400xf32>
    %32 = vector.broadcast %30 : f32 to vector<4x400xf32>
    %33 = arith.mulf %32, %31 : vector<4x400xf32>
    %34 = arith.addf %29, %33 : vector<4x400xf32>
    %c6 = arith.constant 6 : index
    %35 = memref.load %arg3[%c6] : memref<9xf32, #tpu.memory_space<smem>>
    %c0_13 = arith.constant 0 : index
    %c61 = arith.constant 61 : index
    %36 = vector.load %arg12[%c0_13, %c61] : memref<4x484xf32, #tpu.memory_space<vmem>>, vector<4x400xf32>
    %37 = vector.broadcast %35 : f32 to vector<4x400xf32>
    %38 = arith.mulf %37, %36 : vector<4x400xf32>
    %39 = arith.addf %34, %38 : vector<4x400xf32>
    %c7 = arith.constant 7 : index
    %40 = memref.load %arg3[%c7] : memref<9xf32, #tpu.memory_space<smem>>
    %c0_14 = arith.constant 0 : index
    %c62 = arith.constant 62 : index
    %41 = vector.load %arg12[%c0_14, %c62] : memref<4x484xf32, #tpu.memory_space<vmem>>, vector<4x400xf32>
    %42 = vector.broadcast %40 : f32 to vector<4x400xf32>
    %43 = arith.mulf %42, %41 : vector<4x400xf32>
    %44 = arith.addf %39, %43 : vector<4x400xf32>
    %c8 = arith.constant 8 : index
    %45 = memref.load %arg3[%c8] : memref<9xf32, #tpu.memory_space<smem>>
    %c0_15 = arith.constant 0 : index
    %c63 = arith.constant 63 : index
    %46 = vector.load %arg12[%c0_15, %c63] : memref<4x484xf32, #tpu.memory_space<vmem>>, vector<4x400xf32>
    %47 = vector.broadcast %45 : f32 to vector<4x400xf32>
    %48 = arith.mulf %47, %46 : vector<4x400xf32>
    %49 = arith.addf %44, %48 : vector<4x400xf32>
    %50 = vector.broadcast %0 : vector<1x400xf32> to vector<4x400xf32>
    %51 = arith.mulf %49, %50 : vector<4x400xf32>
    %c0_16 = arith.constant 0 : index
    %c42_17 = arith.constant 42 : index
    %52 = vector.load %arg12[%c0_16, %c42_17] : memref<4x484xf32, #tpu.memory_space<vmem>>, vector<4x400xf32>
    tpu.vector_store %arg12[%c0_16, %c42_17], %51 {strides = array<i32>} : memref<4x484xf32, #tpu.memory_space<vmem>>, vector<4x400xf32>,
    %cst_18 = arith.constant 0.000000e+00 : f32
    %53 = vector.broadcast %cst_18 : f32 to vector<4x400xf32>
    %c0_19 = arith.constant 0 : index
    %c0_20 = arith.constant 0 : index
    %54 = vector.load %arg12[%c0_19, %c0_20] : memref<4x484xf32, #tpu.memory_space<vmem>>, vector<4x400xf32>
    %c0_21 = arith.constant 0 : index
    %c0_22 = arith.constant 0 : index
    %c0_23 = arith.constant 0 : index
    %55 = vector.load %arg4[%c0_21, %c0_22, %c0_23] : memref<9x4x4xf32, #tpu.memory_space<vmem>>, vector<1x4x4xf32>
    %56 = vector.shape_cast %55 : vector<1x4x4xf32> to vector<4x4xf32>
    %cst_24 = arith.constant dense<0.000000e+00> : vector<4x400xf32>
    %57 = tpu.matmul %56, %54, %cst_24 {dimension_numbers = #tpu.dot_dimension_numbers<[1], [0], [0], [1], [0, 0, 1, 1], [], []>} : vector<4x4xf32>, vector<4x400xf32>, vector<4x400xf32> -> vector<4x400xf32>
    %58 = arith.addf %53, %57 : vector<4x400xf32>
    %c0_25 = arith.constant 0 : index
    %c2_26 = arith.constant 2 : index
    %59 = vector.load %arg12[%c0_25, %c2_26] : memref<4x484xf32, #tpu.memory_space<vmem>>, vector<4x400xf32>
    %c1_27 = arith.constant 1 : index
    %c0_28 = arith.constant 0 : index
    %c0_29 = arith.constant 0 : index
    %60 = vector.load %arg4[%c1_27, %c0_28, %c0_29] : memref<9x4x4xf32, #tpu.memory_space<vmem>>, vector<1x4x4xf32>
    %61 = vector.shape_cast %60 : vector<1x4x4xf32> to vector<4x4xf32>
    %cst_30 = arith.constant dense<0.000000e+00> : vector<4x400xf32>
    %62 = tpu.matmul %61, %59, %cst_30 {dimension_numbers = #tpu.dot_dimension_numbers<[1], [0], [0], [1], [0, 0, 1, 1], [], []>} : vector<4x4xf32>, vector<4x400xf32>, vector<4x400xf32> -> vector<4x400xf32>
    %63 = arith.addf %58, %62 : vector<4x400xf32>
    %c0_31 = arith.constant 0 : index
    %c4_32 = arith.constant 4 : index
    %64 = vector.load %arg12[%c0_31, %c4_32] : memref<4x484xf32, #tpu.memory_space<vmem>>, vector<4x400xf32>
    %c2_33 = arith.constant 2 : index
    %c0_34 = arith.constant 0 : index
    %c0_35 = arith.constant 0 : index
    %65 = vector.load %arg4[%c2_33, %c0_34, %c0_35] : memref<9x4x4xf32, #tpu.memory_space<vmem>>, vector<1x4x4xf32>
    %66 = vector.shape_cast %65 : vector<1x4x4xf32> to vector<4x4xf32>
    %cst_36 = arith.constant dense<0.000000e+00> : vector<4x400xf32>
    %67 = tpu.matmul %66, %64, %cst_36 {dimension_numbers = #tpu.dot_dimension_numbers<[1], [0], [0], [1], [0, 0, 1, 1], [], []>} : vector<4x4xf32>, vector<4x400xf32>, vector<4x400xf32> -> vector<4x400xf32>
    %68 = arith.addf %63, %67 : vector<4x400xf32>
    %c0_37 = arith.constant 0 : index
    %c40 = arith.constant 40 : index
    %69 = vector.load %arg12[%c0_37, %c40] : memref<4x484xf32, #tpu.memory_space<vmem>>, vector<4x400xf32>
    %c3_38 = arith.constant 3 : index
    %c0_39 = arith.constant 0 : index
    %c0_40 = arith.constant 0 : index
    %70 = vector.load %arg4[%c3_38, %c0_39, %c0_40] : memref<9x4x4xf32, #tpu.memory_space<vmem>>, vector<1x4x4xf32>
    %71 = vector.shape_cast %70 : vector<1x4x4xf32> to vector<4x4xf32>
    %cst_41 = arith.constant dense<0.000000e+00> : vector<4x400xf32>
    %72 = tpu.matmul %71, %69, %cst_41 {dimension_numbers = #tpu.dot_dimension_numbers<[1], [0], [0], [1], [0, 0, 1, 1], [], []>} : vector<4x4xf32>, vector<4x400xf32>, vector<4x400xf32> -> vector<4x400xf32>
    %73 = arith.addf %68, %72 : vector<4x400xf32>
    %c0_42 = arith.constant 0 : index
    %c42_43 = arith.constant 42 : index
    %74 = vector.load %arg12[%c0_42, %c42_43] : memref<4x484xf32, #tpu.memory_space<vmem>>, vector<4x400xf32>
    %c4_44 = arith.constant 4 : index
    %c0_45 = arith.constant 0 : index
    %c0_46 = arith.constant 0 : index
    %75 = vector.load %arg4[%c4_44, %c0_45, %c0_46] : memref<9x4x4xf32, #tpu.memory_space<vmem>>, vector<1x4x4xf32>
    %76 = vector.shape_cast %75 : vector<1x4x4xf32> to vector<4x4xf32>
    %cst_47 = arith.constant dense<0.000000e+00> : vector<4x400xf32>
    %77 = tpu.matmul %76, %74, %cst_47 {dimension_numbers = #tpu.dot_dimension_numbers<[1], [0], [0], [1], [0, 0, 1, 1], [], []>} : vector<4x4xf32>, vector<4x400xf32>, vector<4x400xf32> -> vector<4x400xf32>
    %78 = arith.addf %73, %77 : vector<4x400xf32>
    %c0_48 = arith.constant 0 : index
    %c44 = arith.constant 44 : index
    %79 = vector.load %arg12[%c0_48, %c44] : memref<4x484xf32, #tpu.memory_space<vmem>>, vector<4x400xf32>
    %c5_49 = arith.constant 5 : index
    %c0_50 = arith.constant 0 : index
    %c0_51 = arith.constant 0 : index
    %80 = vector.load %arg4[%c5_49, %c0_50, %c0_51] : memref<9x4x4xf32, #tpu.memory_space<vmem>>, vector<1x4x4xf32>
    %81 = vector.shape_cast %80 : vector<1x4x4xf32> to vector<4x4xf32>
    %cst_52 = arith.constant dense<0.000000e+00> : vector<4x400xf32>
    %82 = tpu.matmul %81, %79, %cst_52 {dimension_numbers = #tpu.dot_dimension_numbers<[1], [0], [0], [1], [0, 0, 1, 1], [], []>} : vector<4x4xf32>, vector<4x400xf32>, vector<4x400xf32> -> vector<4x400xf32>
    %83 = arith.addf %78, %82 : vector<4x400xf32>
    %c0_53 = arith.constant 0 : index
    %c80 = arith.constant 80 : index
    %84 = vector.load %arg12[%c0_53, %c80] : memref<4x484xf32, #tpu.memory_space<vmem>>, vector<4x400xf32>
    %c6_54 = arith.constant 6 : index
    %c0_55 = arith.constant 0 : index
    %c0_56 = arith.constant 0 : index
    %85 = vector.load %arg4[%c6_54, %c0_55, %c0_56] : memref<9x4x4xf32, #tpu.memory_space<vmem>>, vector<1x4x4xf32>
    %86 = vector.shape_cast %85 : vector<1x4x4xf32> to vector<4x4xf32>
    %cst_57 = arith.constant dense<0.000000e+00> : vector<4x400xf32>
    %87 = tpu.matmul %86, %84, %cst_57 {dimension_numbers = #tpu.dot_dimension_numbers<[1], [0], [0], [1], [0, 0, 1, 1], [], []>} : vector<4x4xf32>, vector<4x400xf32>, vector<4x400xf32> -> vector<4x400xf32>
    %88 = arith.addf %83, %87 : vector<4x400xf32>
    %c0_58 = arith.constant 0 : index
    %c82 = arith.constant 82 : index
    %89 = vector.load %arg12[%c0_58, %c82] : memref<4x484xf32, #tpu.memory_space<vmem>>, vector<4x400xf32>
    %c7_59 = arith.constant 7 : index
    %c0_60 = arith.constant 0 : index
    %c0_61 = arith.constant 0 : index
    %90 = vector.load %arg4[%c7_59, %c0_60, %c0_61] : memref<9x4x4xf32, #tpu.memory_space<vmem>>, vector<1x4x4xf32>
    %91 = vector.shape_cast %90 : vector<1x4x4xf32> to vector<4x4xf32>
    %cst_62 = arith.constant dense<0.000000e+00> : vector<4x400xf32>
    %92 = tpu.matmul %91, %89, %cst_62 {dimension_numbers = #tpu.dot_dimension_numbers<[1], [0], [0], [1], [0, 0, 1, 1], [], []>} : vector<4x4xf32>, vector<4x400xf32>, vector<4x400xf32> -> vector<4x400xf32>
    %93 = arith.addf %88, %92 : vector<4x400xf32>
    %c0_63 = arith.constant 0 : index
    %c84 = arith.constant 84 : index
    %94 = vector.load %arg12[%c0_63, %c84] : memref<4x484xf32, #tpu.memory_space<vmem>>, vector<4x400xf32>
    %c8_64 = arith.constant 8 : index
    %c0_65 = arith.constant 0 : index
    %c0_66 = arith.constant 0 : index
    %95 = vector.load %arg4[%c8_64, %c0_65, %c0_66] : memref<9x4x4xf32, #tpu.memory_space<vmem>>, vector<1x4x4xf32>
    %96 = vector.shape_cast %95 : vector<1x4x4xf32> to vector<4x4xf32>
    %cst_67 = arith.constant dense<0.000000e+00> : vector<4x400xf32>
    %97 = tpu.matmul %96, %94, %cst_67 {dimension_numbers = #tpu.dot_dimension_numbers<[1], [0], [0], [1], [0, 0, 1, 1], [], []>} : vector<4x4xf32>, vector<4x400xf32>, vector<4x400xf32> -> vector<4x400xf32>
    %98 = arith.addf %93, %97 : vector<4x400xf32>
    %99 = vector.broadcast %0 : vector<1x400xf32> to vector<4x400xf32>
    %100 = arith.mulf %98, %99 : vector<4x400xf32>
    %cst_68 = arith.constant dense<0.000000e+00> : vector<4xf32>
    %101 = vector.multi_reduction <add>, %100, %cst_68 [1] : vector<4x400xf32> to vector<4xf32>
    %102 = vector.shape_cast %101 : vector<4xf32> to vector<4x1xf32>
    %cst_69 = arith.constant 3.906250e-03 : f32
    %103 = vector.broadcast %cst_69 : f32 to vector<4x1xf32>
    %104 = arith.mulf %102, %103 : vector<4x1xf32>
    %105 = vector.broadcast %104 : vector<4x1xf32> to vector<4x400xf32>
    %106 = arith.subf %98, %105 : vector<4x400xf32>
    %107 = arith.mulf %106, %106 : vector<4x400xf32>
    %108 = vector.broadcast %0 : vector<1x400xf32> to vector<4x400xf32>
    %109 = arith.mulf %107, %108 : vector<4x400xf32>
    %cst_70 = arith.constant dense<0.000000e+00> : vector<4xf32>
    %110 = vector.multi_reduction <add>, %109, %cst_70 [1] : vector<4x400xf32> to vector<4xf32>
    %111 = vector.shape_cast %110 : vector<4xf32> to vector<4x1xf32>
    %cst_71 = arith.constant 3.906250e-03 : f32
    %112 = vector.broadcast %cst_71 : f32 to vector<4x1xf32>
    %113 = arith.mulf %111, %112 : vector<4x1xf32>
    %c0_72 = arith.constant 0 : index
    %c0_73 = arith.constant 0 : index
    %114 = vector.load %arg5[%c0_72, %c0_73] : memref<4x1xf32, #tpu.memory_space<vmem>>, vector<4x1xf32>
    %cst_74 = arith.constant 9.99999974E-6 : f32
    %115 = vector.broadcast %cst_74 : f32 to vector<4x1xf32>
    %116 = arith.addf %113, %115 : vector<4x1xf32>
    %117 = math.rsqrt %116 : vector<4x1xf32>
    %118 = arith.mulf %114, %117 : vector<4x1xf32>
    %c0_75 = arith.constant 0 : index
    %c0_76 = arith.constant 0 : index
    %119 = vector.load %arg6[%c0_75, %c0_76] : memref<4x1xf32, #tpu.memory_space<vmem>>, vector<4x1xf32>
    %120 = arith.mulf %104, %118 : vector<4x1xf32>
    %121 = arith.subf %119, %120 : vector<4x1xf32>
    %122 = vector.broadcast %118 : vector<4x1xf32> to vector<4x400xf32>
    %123 = arith.mulf %98, %122 : vector<4x400xf32>
    %124 = vector.broadcast %121 : vector<4x1xf32> to vector<4x400xf32>
    %125 = arith.addf %123, %124 : vector<4x400xf32>
    %cst_77 = arith.constant 0.000000e+00 : f32
    %126 = vector.broadcast %cst_77 : f32 to vector<4x400xf32>
    %127 = arith.maximumf %125, %126 : vector<4x400xf32>
    %128 = vector.broadcast %0 : vector<1x400xf32> to vector<4x400xf32>
    %129 = arith.mulf %127, %128 : vector<4x400xf32>
    %c0_78 = arith.constant 0 : index
    %c42_79 = arith.constant 42 : index
    %130 = vector.load %arg12[%c0_78, %c42_79] : memref<4x484xf32, #tpu.memory_space<vmem>>, vector<4x400xf32>
    tpu.vector_store %arg12[%c0_78, %c42_79], %129 {strides = array<i32>} : memref<4x484xf32, #tpu.memory_space<vmem>>, vector<4x400xf32>,
    %cst_80 = arith.constant 0.000000e+00 : f32
    %131 = vector.broadcast %cst_80 : f32 to vector<4x400xf32>
    %c0_81 = arith.constant 0 : index
    %132 = memref.load %arg7[%c0_81] : memref<9xf32, #tpu.memory_space<smem>>
    %c0_82 = arith.constant 0 : index
    %c21_83 = arith.constant 21 : index
    %133 = vector.load %arg12[%c0_82, %c21_83] : memref<4x484xf32, #tpu.memory_space<vmem>>, vector<4x400xf32>
    %134 = vector.broadcast %132 : f32 to vector<4x400xf32>
    %135 = arith.mulf %134, %133 : vector<4x400xf32>
    %136 = arith.addf %131, %135 : vector<4x400xf32>
    %c1_84 = arith.constant 1 : index
    %137 = memref.load %arg7[%c1_84] : memref<9xf32, #tpu.memory_space<smem>>
    %c0_85 = arith.constant 0 : index
    %c22_86 = arith.constant 22 : index
    %138 = vector.load %arg12[%c0_85, %c22_86] : memref<4x484xf32, #tpu.memory_space<vmem>>, vector<4x400xf32>
    %139 = vector.broadcast %137 : f32 to vector<4x400xf32>
    %140 = arith.mulf %139, %138 : vector<4x400xf32>
    %141 = arith.addf %136, %140 : vector<4x400xf32>
    %c2_87 = arith.constant 2 : index
    %142 = memref.load %arg7[%c2_87] : memref<9xf32, #tpu.memory_space<smem>>
    %c0_88 = arith.constant 0 : index
    %c23_89 = arith.constant 23 : index
    %143 = vector.load %arg12[%c0_88, %c23_89] : memref<4x484xf32, #tpu.memory_space<vmem>>, vector<4x400xf32>
    %144 = vector.broadcast %142 : f32 to vector<4x400xf32>
    %145 = arith.mulf %144, %143 : vector<4x400xf32>
    %146 = arith.addf %141, %145 : vector<4x400xf32>
    %c3_90 = arith.constant 3 : index
    %147 = memref.load %arg7[%c3_90] : memref<9xf32, #tpu.memory_space<smem>>
    %c0_91 = arith.constant 0 : index
    %c41_92 = arith.constant 41 : index
    %148 = vector.load %arg12[%c0_91, %c41_92] : memref<4x484xf32, #tpu.memory_space<vmem>>, vector<4x400xf32>
    %149 = vector.broadcast %147 : f32 to vector<4x400xf32>
    %150 = arith.mulf %149, %148 : vector<4x400xf32>
    %151 = arith.addf %146, %150 : vector<4x400xf32>
    %c4_93 = arith.constant 4 : index
    %152 = memref.load %arg7[%c4_93] : memref<9xf32, #tpu.memory_space<smem>>
    %c0_94 = arith.constant 0 : index
    %c42_95 = arith.constant 42 : index
    %153 = vector.load %arg12[%c0_94, %c42_95] : memref<4x484xf32, #tpu.memory_space<vmem>>, vector<4x400xf32>
    %154 = vector.broadcast %152 : f32 to vector<4x400xf32>
    %155 = arith.mulf %154, %153 : vector<4x400xf32>
    %156 = arith.addf %151, %155 : vector<4x400xf32>
    %c5_96 = arith.constant 5 : index
    %157 = memref.load %arg7[%c5_96] : memref<9xf32, #tpu.memory_space<smem>>
    %c0_97 = arith.constant 0 : index
    %c43_98 = arith.constant 43 : index
    %158 = vector.load %arg12[%c0_97, %c43_98] : memref<4x484xf32, #tpu.memory_space<vmem>>, vector<4x400xf32>
    %159 = vector.broadcast %157 : f32 to vector<4x400xf32>
    %160 = arith.mulf %159, %158 : vector<4x400xf32>
    %161 = arith.addf %156, %160 : vector<4x400xf32>
    %c6_99 = arith.constant 6 : index
    %162 = memref.load %arg7[%c6_99] : memref<9xf32, #tpu.memory_space<smem>>
    %c0_100 = arith.constant 0 : index
    %c61_101 = arith.constant 61 : index
    %163 = vector.load %arg12[%c0_100, %c61_101] : memref<4x484xf32, #tpu.memory_space<vmem>>, vector<4x400xf32>
    %164 = vector.broadcast %162 : f32 to vector<4x400xf32>
    %165 = arith.mulf %164, %163 : vector<4x400xf32>
    %166 = arith.addf %161, %165 : vector<4x400xf32>
    %c7_102 = arith.constant 7 : index
    %167 = memref.load %arg7[%c7_102] : memref<9xf32, #tpu.memory_space<smem>>
    %c0_103 = arith.constant 0 : index
    %c62_104 = arith.constant 62 : index
    %168 = vector.load %arg12[%c0_103, %c62_104] : memref<4x484xf32, #tpu.memory_space<vmem>>, vector<4x400xf32>
    %169 = vector.broadcast %167 : f32 to vector<4x400xf32>
    %170 = arith.mulf %169, %168 : vector<4x400xf32>
    %171 = arith.addf %166, %170 : vector<4x400xf32>
    %c8_105 = arith.constant 8 : index
    %172 = memref.load %arg7[%c8_105] : memref<9xf32, #tpu.memory_space<smem>>
    %c0_106 = arith.constant 0 : index
    %c63_107 = arith.constant 63 : index
    %173 = vector.load %arg12[%c0_106, %c63_107] : memref<4x484xf32, #tpu.memory_space<vmem>>, vector<4x400xf32>
    %174 = vector.broadcast %172 : f32 to vector<4x400xf32>
    %175 = arith.mulf %174, %173 : vector<4x400xf32>
    %176 = arith.addf %171, %175 : vector<4x400xf32>
    %177 = vector.broadcast %0 : vector<1x400xf32> to vector<4x400xf32>
    %178 = arith.mulf %176, %177 : vector<4x400xf32>
    %c0_108 = arith.constant 0 : index
    %c42_109 = arith.constant 42 : index
    %179 = vector.load %arg12[%c0_108, %c42_109] : memref<4x484xf32, #tpu.memory_space<vmem>>, vector<4x400xf32>
    tpu.vector_store %arg12[%c0_108, %c42_109], %178 {strides = array<i32>} : memref<4x484xf32, #tpu.memory_space<vmem>>, vector<4x400xf32>,
    %cst_110 = arith.constant 0.000000e+00 : f32
    %180 = vector.broadcast %cst_110 : f32 to vector<4x400xf32>
    %c0_111 = arith.constant 0 : index
    %c21_112 = arith.constant 21 : index
    %181 = vector.load %arg12[%c0_111, %c21_112] : memref<4x484xf32, #tpu.memory_space<vmem>>, vector<4x400xf32>
    %c0_113 = arith.constant 0 : index
    %c0_114 = arith.constant 0 : index
    %c0_115 = arith.constant 0 : index
    %182 = vector.load %arg8[%c0_113, %c0_114, %c0_115] : memref<9x4x4xf32, #tpu.memory_space<vmem>>, vector<1x4x4xf32>
    %183 = vector.shape_cast %182 : vector<1x4x4xf32> to vector<4x4xf32>
    %cst_116 = arith.constant dense<0.000000e+00> : vector<4x400xf32>
    %184 = tpu.matmul %183, %181, %cst_116 {dimension_numbers = #tpu.dot_dimension_numbers<[1], [0], [0], [1], [0, 0, 1, 1], [], []>} : vector<4x4xf32>, vector<4x400xf32>, vector<4x400xf32> -> vector<4x400xf32>
    %185 = arith.addf %180, %184 : vector<4x400xf32>
    %c0_117 = arith.constant 0 : index
    %c22_118 = arith.constant 22 : index
    %186 = vector.load %arg12[%c0_117, %c22_118] : memref<4x484xf32, #tpu.memory_space<vmem>>, vector<4x400xf32>
    %c1_119 = arith.constant 1 : index
    %c0_120 = arith.constant 0 : index
    %c0_121 = arith.constant 0 : index
    %187 = vector.load %arg8[%c1_119, %c0_120, %c0_121] : memref<9x4x4xf32, #tpu.memory_space<vmem>>, vector<1x4x4xf32>
    %188 = vector.shape_cast %187 : vector<1x4x4xf32> to vector<4x4xf32>
    %cst_122 = arith.constant dense<0.000000e+00> : vector<4x400xf32>
    %189 = tpu.matmul %188, %186, %cst_122 {dimension_numbers = #tpu.dot_dimension_numbers<[1], [0], [0], [1], [0, 0, 1, 1], [], []>} : vector<4x4xf32>, vector<4x400xf32>, vector<4x400xf32> -> vector<4x400xf32>
    %190 = arith.addf %185, %189 : vector<4x400xf32>
    %c0_123 = arith.constant 0 : index
    %c23_124 = arith.constant 23 : index
    %191 = vector.load %arg12[%c0_123, %c23_124] : memref<4x484xf32, #tpu.memory_space<vmem>>, vector<4x400xf32>
    %c2_125 = arith.constant 2 : index
    %c0_126 = arith.constant 0 : index
    %c0_127 = arith.constant 0 : index
    %192 = vector.load %arg8[%c2_125, %c0_126, %c0_127] : memref<9x4x4xf32, #tpu.memory_space<vmem>>, vector<1x4x4xf32>
    %193 = vector.shape_cast %192 : vector<1x4x4xf32> to vector<4x4xf32>
    %cst_128 = arith.constant dense<0.000000e+00> : vector<4x400xf32>
    %194 = tpu.matmul %193, %191, %cst_128 {dimension_numbers = #tpu.dot_dimension_numbers<[1], [0], [0], [1], [0, 0, 1, 1], [], []>} : vector<4x4xf32>, vector<4x400xf32>, vector<4x400xf32> -> vector<4x400xf32>
    %195 = arith.addf %190, %194 : vector<4x400xf32>
    %c0_129 = arith.constant 0 : index
    %c41_130 = arith.constant 41 : index
    %196 = vector.load %arg12[%c0_129, %c41_130] : memref<4x484xf32, #tpu.memory_space<vmem>>, vector<4x400xf32>
    %c3_131 = arith.constant 3 : index
    %c0_132 = arith.constant 0 : index
    %c0_133 = arith.constant 0 : index
    %197 = vector.load %arg8[%c3_131, %c0_132, %c0_133] : memref<9x4x4xf32, #tpu.memory_space<vmem>>, vector<1x4x4xf32>
    %198 = vector.shape_cast %197 : vector<1x4x4xf32> to vector<4x4xf32>
    %cst_134 = arith.constant dense<0.000000e+00> : vector<4x400xf32>
    %199 = tpu.matmul %198, %196, %cst_134 {dimension_numbers = #tpu.dot_dimension_numbers<[1], [0], [0], [1], [0, 0, 1, 1], [], []>} : vector<4x4xf32>, vector<4x400xf32>, vector<4x400xf32> -> vector<4x400xf32>
    %200 = arith.addf %195, %199 : vector<4x400xf32>
    %c0_135 = arith.constant 0 : index
    %c42_136 = arith.constant 42 : index
    %201 = vector.load %arg12[%c0_135, %c42_136] : memref<4x484xf32, #tpu.memory_space<vmem>>, vector<4x400xf32>
    %c4_137 = arith.constant 4 : index
    %c0_138 = arith.constant 0 : index
    %c0_139 = arith.constant 0 : index
    %202 = vector.load %arg8[%c4_137, %c0_138, %c0_139] : memref<9x4x4xf32, #tpu.memory_space<vmem>>, vector<1x4x4xf32>
    %203 = vector.shape_cast %202 : vector<1x4x4xf32> to vector<4x4xf32>
    %cst_140 = arith.constant dense<0.000000e+00> : vector<4x400xf32>
    %204 = tpu.matmul %203, %201, %cst_140 {dimension_numbers = #tpu.dot_dimension_numbers<[1], [0], [0], [1], [0, 0, 1, 1], [], []>} : vector<4x4xf32>, vector<4x400xf32>, vector<4x400xf32> -> vector<4x400xf32>
    %205 = arith.addf %200, %204 : vector<4x400xf32>
    %c0_141 = arith.constant 0 : index
    %c43_142 = arith.constant 43 : index
    %206 = vector.load %arg12[%c0_141, %c43_142] : memref<4x484xf32, #tpu.memory_space<vmem>>, vector<4x400xf32>
    %c5_143 = arith.constant 5 : index
    %c0_144 = arith.constant 0 : index
    %c0_145 = arith.constant 0 : index
    %207 = vector.load %arg8[%c5_143, %c0_144, %c0_145] : memref<9x4x4xf32, #tpu.memory_space<vmem>>, vector<1x4x4xf32>
    %208 = vector.shape_cast %207 : vector<1x4x4xf32> to vector<4x4xf32>
    %cst_146 = arith.constant dense<0.000000e+00> : vector<4x400xf32>
    %209 = tpu.matmul %208, %206, %cst_146 {dimension_numbers = #tpu.dot_dimension_numbers<[1], [0], [0], [1], [0, 0, 1, 1], [], []>} : vector<4x4xf32>, vector<4x400xf32>, vector<4x400xf32> -> vector<4x400xf32>
    %210 = arith.addf %205, %209 : vector<4x400xf32>
    %c0_147 = arith.constant 0 : index
    %c61_148 = arith.constant 61 : index
    %211 = vector.load %arg12[%c0_147, %c61_148] : memref<4x484xf32, #tpu.memory_space<vmem>>, vector<4x400xf32>
    %c6_149 = arith.constant 6 : index
    %c0_150 = arith.constant 0 : index
    %c0_151 = arith.constant 0 : index
    %212 = vector.load %arg8[%c6_149, %c0_150, %c0_151] : memref<9x4x4xf32, #tpu.memory_space<vmem>>, vector<1x4x4xf32>
    %213 = vector.shape_cast %212 : vector<1x4x4xf32> to vector<4x4xf32>
    %cst_152 = arith.constant dense<0.000000e+00> : vector<4x400xf32>
    %214 = tpu.matmul %213, %211, %cst_152 {dimension_numbers = #tpu.dot_dimension_numbers<[1], [0], [0], [1], [0, 0, 1, 1], [], []>} : vector<4x4xf32>, vector<4x400xf32>, vector<4x400xf32> -> vector<4x400xf32>
    %215 = arith.addf %210, %214 : vector<4x400xf32>
    %c0_153 = arith.constant 0 : index
    %c62_154 = arith.constant 62 : index
    %216 = vector.load %arg12[%c0_153, %c62_154] : memref<4x484xf32, #tpu.memory_space<vmem>>, vector<4x400xf32>
    %c7_155 = arith.constant 7 : index
    %c0_156 = arith.constant 0 : index
    %c0_157 = arith.constant 0 : index
    %217 = vector.load %arg8[%c7_155, %c0_156, %c0_157] : memref<9x4x4xf32, #tpu.memory_space<vmem>>, vector<1x4x4xf32>
    %218 = vector.shape_cast %217 : vector<1x4x4xf32> to vector<4x4xf32>
    %cst_158 = arith.constant dense<0.000000e+00> : vector<4x400xf32>
    %219 = tpu.matmul %218, %216, %cst_158 {dimension_numbers = #tpu.dot_dimension_numbers<[1], [0], [0], [1], [0, 0, 1, 1], [], []>} : vector<4x4xf32>, vector<4x400xf32>, vector<4x400xf32> -> vector<4x400xf32>
    %220 = arith.addf %215, %219 : vector<4x400xf32>
    %c0_159 = arith.constant 0 : index
    %c63_160 = arith.constant 63 : index
    %221 = vector.load %arg12[%c0_159, %c63_160] : memref<4x484xf32, #tpu.memory_space<vmem>>, vector<4x400xf32>
    %c8_161 = arith.constant 8 : index
    %c0_162 = arith.constant 0 : index
    %c0_163 = arith.constant 0 : index
    %222 = vector.load %arg8[%c8_161, %c0_162, %c0_163] : memref<9x4x4xf32, #tpu.memory_space<vmem>>, vector<1x4x4xf32>
    %223 = vector.shape_cast %222 : vector<1x4x4xf32> to vector<4x4xf32>
    %cst_164 = arith.constant dense<0.000000e+00> : vector<4x400xf32>
    %224 = tpu.matmul %223, %221, %cst_164 {dimension_numbers = #tpu.dot_dimension_numbers<[1], [0], [0], [1], [0, 0, 1, 1], [], []>} : vector<4x4xf32>, vector<4x400xf32>, vector<4x400xf32> -> vector<4x400xf32>
    %225 = arith.addf %220, %224 : vector<4x400xf32>
    %226 = vector.broadcast %0 : vector<1x400xf32> to vector<4x400xf32>
    %227 = arith.mulf %225, %226 : vector<4x400xf32>
    %cst_165 = arith.constant dense<0.000000e+00> : vector<4xf32>
    %228 = vector.multi_reduction <add>, %227, %cst_165 [1] : vector<4x400xf32> to vector<4xf32>
    %229 = vector.shape_cast %228 : vector<4xf32> to vector<4x1xf32>
    %cst_166 = arith.constant 3.906250e-03 : f32
    %230 = vector.broadcast %cst_166 : f32 to vector<4x1xf32>
    %231 = arith.mulf %229, %230 : vector<4x1xf32>
    %232 = vector.broadcast %231 : vector<4x1xf32> to vector<4x400xf32>
    %233 = arith.subf %225, %232 : vector<4x400xf32>
    %234 = arith.mulf %233, %233 : vector<4x400xf32>
    %235 = vector.broadcast %0 : vector<1x400xf32> to vector<4x400xf32>
    %236 = arith.mulf %234, %235 : vector<4x400xf32>
    %cst_167 = arith.constant dense<0.000000e+00> : vector<4xf32>
    %237 = vector.multi_reduction <add>, %236, %cst_167 [1] : vector<4x400xf32> to vector<4xf32>
    %238 = vector.shape_cast %237 : vector<4xf32> to vector<4x1xf32>
    %cst_168 = arith.constant 3.906250e-03 : f32
    %239 = vector.broadcast %cst_168 : f32 to vector<4x1xf32>
    %240 = arith.mulf %238, %239 : vector<4x1xf32>
    %c0_169 = arith.constant 0 : index
    %c0_170 = arith.constant 0 : index
    %241 = vector.load %arg9[%c0_169, %c0_170] : memref<4x1xf32, #tpu.memory_space<vmem>>, vector<4x1xf32>
    %cst_171 = arith.constant 9.99999974E-6 : f32
    %242 = vector.broadcast %cst_171 : f32 to vector<4x1xf32>
    %243 = arith.addf %240, %242 : vector<4x1xf32>
    %244 = math.rsqrt %243 : vector<4x1xf32>
    %245 = arith.mulf %241, %244 : vector<4x1xf32>
    %c0_172 = arith.constant 0 : index
    %c0_173 = arith.constant 0 : index
    %246 = vector.load %arg10[%c0_172, %c0_173] : memref<4x1xf32, #tpu.memory_space<vmem>>, vector<4x1xf32>
    %247 = arith.mulf %231, %245 : vector<4x1xf32>
    %248 = arith.subf %246, %247 : vector<4x1xf32>
    %249 = vector.broadcast %245 : vector<4x1xf32> to vector<4x400xf32>
    %250 = arith.mulf %225, %249 : vector<4x400xf32>
    %251 = vector.broadcast %248 : vector<4x1xf32> to vector<4x400xf32>
    %252 = arith.addf %250, %251 : vector<4x400xf32>
    %cst_174 = arith.constant 0.000000e+00 : f32
    %253 = vector.broadcast %cst_174 : f32 to vector<4x400xf32>
    %254 = arith.maximumf %252, %253 : vector<4x400xf32>
    %c0_175 = arith.constant 0 : index
    %c0_176 = arith.constant 0 : index
    %c0_177 = arith.constant 0 : index
    %255 = vector.load %arg11[%c0_175, %c0_176, %c0_177] : memref<1x4x400xf32, #tpu.memory_space<vmem>>, vector<1x4x400xf32>
    %256 = vector.shape_cast %255 : vector<1x4x400xf32> to vector<4x400xf32>
    %257 = vector.shape_cast %254 : vector<4x400xf32> to vector<1x4x400xf32>
    tpu.vector_store %arg11[%c0_175, %c0_176, %c0_177], %257 {strides = array<i32>} : memref<1x4x400xf32, #tpu.memory_space<vmem>>, vector<1x4x400xf32>,
    return
  }
  func.func @transform_0(%arg0: i32) -> (i32, i32, i32) {
    %c0_i32 = arith.constant 0 : i32
    %c0_i32_0 = arith.constant 0 : i32
    %c0_i32_1 = arith.constant 0 : i32
    return %arg0, %c0_i32, %c0_i32_0 : i32, i32, i32
  }
  func.func @transform_1(%arg0: i32) -> (i32, i32) {
    %c0_i32 = arith.constant 0 : i32
    %c0_i32_0 = arith.constant 0 : i32
    %c0_i32_1 = arith.constant 0 : i32
    return %c0_i32, %c0_i32_0 : i32, i32
  }
  func.func @transform_2(%arg0: i32) -> i32 {
    %c0_i32 = arith.constant 0 : i32
    %c0_i32_0 = arith.constant 0 : i32
    return %c0_i32 : i32
  }
  func.func @transform_3(%arg0: i32) -> (i32, i32, i32) {
    %c0_i32 = arith.constant 0 : i32
    %c0_i32_0 = arith.constant 0 : i32
    %c0_i32_1 = arith.constant 0 : i32
    %c0_i32_2 = arith.constant 0 : i32
    return %c0_i32, %c0_i32_0, %c0_i32_1 : i32, i32, i32
  }
  func.func @transform_4(%arg0: i32) -> (i32, i32) {
    %c0_i32 = arith.constant 0 : i32
    %c0_i32_0 = arith.constant 0 : i32
    %c0_i32_1 = arith.constant 0 : i32
    return %c0_i32, %c0_i32_0 : i32, i32
  }
  func.func @transform_5(%arg0: i32) -> (i32, i32) {
    %c0_i32 = arith.constant 0 : i32
    %c0_i32_0 = arith.constant 0 : i32
    %c0_i32_1 = arith.constant 0 : i32
    return %c0_i32, %c0_i32_0 : i32, i32
  }
  func.func @transform_6(%arg0: i32) -> i32 {
    %c0_i32 = arith.constant 0 : i32
    %c0_i32_0 = arith.constant 0 : i32
    return %c0_i32 : i32
  }
  func.func @transform_7(%arg0: i32) -> (i32, i32, i32) {
    %c0_i32 = arith.constant 0 : i32
    %c0_i32_0 = arith.constant 0 : i32
    %c0_i32_1 = arith.constant 0 : i32
    %c0_i32_2 = arith.constant 0 : i32
    return %c0_i32, %c0_i32_0, %c0_i32_1 : i32, i32, i32
  }
  func.func @transform_8(%arg0: i32) -> (i32, i32) {
    %c0_i32 = arith.constant 0 : i32
    %c0_i32_0 = arith.constant 0 : i32
    %c0_i32_1 = arith.constant 0 : i32
    return %c0_i32, %c0_i32_0 : i32, i32
  }
  func.func @transform_9(%arg0: i32) -> (i32, i32) {
    %c0_i32 = arith.constant 0 : i32
    %c0_i32_0 = arith.constant 0 : i32
    %c0_i32_1 = arith.constant 0 : i32
    return %c0_i32, %c0_i32_0 : i32, i32
  }
  func.func @transform_10(%arg0: i32) -> (i32, i32, i32) {
    %c0_i32 = arith.constant 0 : i32
    %c0_i32_0 = arith.constant 0 : i32
    %c0_i32_1 = arith.constant 0 : i32
    return %arg0, %c0_i32, %c0_i32_0 : i32, i32, i32
  }
}

</mosaic_0001>

<bundles_post_ra>
// kernel: tpu_custom_call.1
= control target key start
LH: loop header
LB: loop body
LE: loop exit
PB: predicated region body
PF: predicated region fallthrough
CT: control target
= control target key end

     0   :  { %s6018_s0 = inlined_call_operand.hbm [shape: f32[2,4,484], index: 0, kind: input, shape index: {}]   ;;  %s6019_s1 = inlined_call_operand.hbm [shape: f32[1,400], index: 1, kind: input, shape index: {}]   ;;  %s6020_s2 = inlined_call_operand.hbm [shape: f32[9], index: 2, kind: input, shape index: {}]   ;;  %s6021_s3 = inlined_call_operand.hbm [shape: f32[9,4,4], index: 3, kind: input, shape index: {}]   ;;  %s6022_s4 = inlined_call_operand.hbm [shape: f32[4,1], index: 4, kind: input, shape index: {}]   ;;  %s6023_s5 = inlined_call_operand.hbm [shape: f32[4,1], index: 5, kind: input, shape index: {}]   ;;  %s6024_s6 = inlined_call_operand.hbm [shape: f32[9], index: 6, kind: input, shape index: {}]   ;;  %s6025_s7 = inlined_call_operand.hbm [shape: f32[9,4,4], index: 7, kind: input, shape index: {}]   ;;  %s6026_s8 = inlined_call_operand.hbm [shape: f32[4,1], index: 8, kind: input, shape index: {}]   ;;  %s6027_s9 = inlined_call_operand.hbm [shape: f32[4,1], index: 9, kind: input, shape index: {}]   ;;  %s6028_s10 = inlined_call_operand.hbm [shape: f32[2,4,400], index: 10, kind: output, shape index: {}]  }
   0x1   :  { %6040 = sst [smem:[#allocation31_spill]] %s6019_s1 }
   0x2   :  { %6041 = sst [smem:[#allocation32_spill]] %s6020_s2 }
   0x3   :  { %15 = vsyncpa [#allocation4], 0 }
   0x4   :  { %17 = vsyncpa [#allocation4 + $0x1], 0 }
   0x5   :  { %18 = vsyncpa [#allocation8], 0 }
   0x6   :  { %19 = vsyncpa [#allocation6], 0 }
   0x7   :  { %20 = vsyncpa [#allocation12], 0 }
   0x8   :  { %21 = vsyncpa [#allocation15], 0 }
   0x9   :  { %22 = vsyncpa [#allocation17], 0 }
   0xa   :  { %23 = vsyncpa [#allocation20], 0 }
   0xb   :  { %24 = vsyncpa [#allocation5], 0 }
   0xc   :  { %26 = vsyncpa [#allocation5 + $0x1], 0  ;;  %s5211_s13 = smov 0   ;;  %s5213_s14 = smov 0  }
   0xd   :  { %s5215_s15 = smov 0   ;;  %s5217_s16 = smov 0  }
   0xe LB: > { %s5121_s17 = smov [#allocation7]   ;;  %s5232_s19 = sadd.s32 4294967295, %s5119_s16   ;;  %s5119_s16 = sphi %s5217_s16, %s6082_s16   ;;  %s5115_s15 = sphi %s5215_s15, %s6081_s15   ;;  %s5111_s14 = sphi %s5213_s14, %s6080_s14   ;;  %s5107_s13 = sphi %s5211_s13, %s6079_s13  }
   0xf   : > { %s291_s18 = sshll.u32 %s5121_s17, 4  ;;  %p4381_p0 = scmp.ge.s32.totalorder %s5119_s16, 1  ;;  %s292_s18 = int_to_ptr.vmem [resolvable:$true] %s291_s18 }
  0x10   : > { %p6029_p1 = scmp.eq.s32.totalorder %s5232_s19, 0  ;;  %p278_p2 = scmp.lt.s32.totalorder %s5119_s16, 3 }
  0x11   : > { %s5122_s21 = smov [#allocation11]   ;;  %s5123_s24 = smov [#allocation16]  }
  0x12   : > { %p5237_p3 = pnand %p4381_p0, %p278_p2  ;;  %s324_s22 = sshll.u32 %s5122_s21, 4  ;;  %s5244_s22 = int_to_ptr.vmem [resolvable:$true] %s324_s22 }
  0x13   : > { %s354_s25 = sshll.u32 %s5123_s24, 4  ;;  %s6044_s1 = sld [smem:[#allocation31_spill]]  ;;  %s5252_s25 = int_to_ptr.vmem [resolvable:$true] %s354_s25 }
  0x14   : > { %s6042_s20 = scalar_select %p5237_p3, 1, 0 }
  0x15   : > { %p4642_p5 = pneg %p5237_p3 }
  0x17   : > { %p5248_p6 = pnand %p4642_p5, %p6029_p1 }
  0x19   : > { %s4773_s28 = scalar_lea.hbm %s6044_s1, 64  ;;  %p5262_p8 = pneg %p5248_p6 }
  0x1a   : > { %p4774_p7 = scmp.ne.s32.totalorder %s6044_s1, %s4773_s28  ;;  %p4780_p11 = scmp.lt.u32.totalorder %s4773_s28, %s6044_s1 }
  0x1c   : > { %p4776_p9 = pnand %p5262_p8, %p4774_p7 }
  0x1e   : > { %p4777_p10 = pneg %p4776_p9 }
  0x20   : > { %p4782_p12 = pnand %p4780_p11, %p4777_p10 }
  0x22   : > { %4785 = shalt.err (!%p4782_p12)
}
  0x23   : > { %s4786_s21 = scalar_lea.vmem %s292_s18, 64  ;;  %p4794_p5 = scmp.lt.s32.totalorder %s292_s18, %s292_s18 }
  0x24   : > { %p4787_p13 = scmp.ne.s32.totalorder %s292_s18, %s4786_s21  ;;  %p4795_p4 = scmp.lt.s32.totalorder %s4786_s21, %s4786_s21 }
  0x26   : > { %p4789_p0 = pnand %p4787_p13, %p5262_p8  ;;  %p4796_p1 = por %p4795_p4, %p4794_p5 }
  0x28   : > { %p4790_p2 = pneg %p4789_p0 }
  0x2a   : > { %p4797_p3 = pnand %p4796_p1, %p4790_p2 }
  0x2c   : > { %4800 = shalt.err (!%p4797_p3)
}
  0x2d   : > { %4645 = dma.hbm_to_vmem [thread:$0]  (!%p5248_p6), %s6044_s1, 64, %s292_s18, [#allocation8]  }
  0x2e   : > { %s4801_s29 = scalar_lea.hbm %s6022_s4, 64 }
  0x2f   : > { %p4802_p7 = scmp.ne.s32.totalorder %s6022_s4, %s4801_s29  ;;  %p4808_p1 = scmp.lt.u32.totalorder %s4801_s29, %s6022_s4 }
  0x31   : > { %p4804_p9 = pnand %p4802_p7, %p5262_p8 }
  0x33   : > { %p4805_p4 = pneg %p4804_p9 }
  0x35   : > { %p4810_p3 = pnand %p4808_p1, %p4805_p4 }
  0x37   : > { %4813 = shalt.err (!%p4810_p3)
}
  0x38   : > { %s4814_s18 = scalar_lea.vmem %s5244_s22, 64  ;;  %p4822_p13 = scmp.lt.s32.totalorder %s5244_s22, %s5244_s22 }
  0x39   : > { %p4815_p10 = scmp.ne.s32.totalorder %s5244_s22, %s4814_s18  ;;  %p4823_p0 = scmp.lt.s32.totalorder %s4814_s18, %s4814_s18 }
  0x3b   : > { %p4817_p11 = pnand %p4815_p10, %p5262_p8  ;;  %p4824_p2 = por %p4823_p0, %p4822_p13 }
  0x3d   : > { %p4818_p12 = pneg %p4817_p11 }
  0x3f   : > { %p4825_p5 = pnand %p4824_p2, %p4818_p12 }
  0x41   : > { %4828 = shalt.err (!%p4825_p5)
}
  0x42   : > { %4654 = dma.hbm_to_vmem [thread:$0]  (!%p5248_p6), %s6022_s4, 64, %s5244_s22, [#allocation12]  }
  0x43   : > { %s4829_s29 = scalar_lea.hbm %s6025_s7, 576 }
  0x44   : > { %p4830_p7 = scmp.ne.s32.totalorder %s6025_s7, %s4829_s29  ;;  %p4836_p1 = scmp.lt.u32.totalorder %s4829_s29, %s6025_s7 }
  0x46   : > { %p4832_p9 = pnand %p4830_p7, %p5262_p8 }
  0x48   : > { %p4833_p4 = pneg %p4832_p9 }
  0x4a   : > { %p4838_p3 = pnand %p4836_p1, %p4833_p4 }
  0x4c   : > { %4841 = shalt.err (!%p4838_p3)
}
  0x4d   : > { %s4842_s22 = scalar_lea.vmem %s5252_s25, 576  ;;  %p4850_p13 = scmp.lt.s32.totalorder %s5252_s25, %s5252_s25 }
  0x4e   : > { %p4843_p10 = scmp.ne.s32.totalorder %s5252_s25, %s4842_s22  ;;  %p4851_p0 = scmp.lt.s32.totalorder %s4842_s22, %s4842_s22 }
  0x50   : > { %p4845_p11 = pnand %p4843_p10, %p5262_p8  ;;  %p4852_p2 = por %p4851_p0, %p4850_p13 }
  0x52   : > { %p4846_p12 = pneg %p4845_p11 }
  0x54   : > { %p4853_p5 = pnand %p4852_p2, %p4846_p12 }
  0x56   : > { %4856 = shalt.err (!%p4853_p5)
}
  0x57   : > { %s6031_s18 = smov 64   ;;  %s5125_s24 = smov 4  }
  0x58   : > { %4663 = dma.hbm_to_vmem [thread:$0]  (!%p5248_p6), %s6025_s7, 576, %s5252_s25, [#allocation17], %s6031_s18, %s6031_s18, %s5125_s24  }
  0x59   : > { %s6046_s2 = sld [smem:[#allocation32_spill]] }
  0x5f   : > { %s4857_s30 = scalar_lea.hbm %s6046_s2, 16 }
  0x60   : > { %p4858_p7 = scmp.ne.s32.totalorder %s6046_s2, %s4857_s30  ;;  %p4864_p1 = scmp.lt.u32.totalorder %s4857_s30, %s6046_s2 }
  0x62   : > { %p4860_p9 = pnand %p4858_p7, %p5262_p8 }
  0x64   : > { %p4861_p4 = pneg %p4860_p9 }
  0x66   : > { %p4866_p3 = pnand %p4864_p1, %p4861_p4 }
  0x68   : > { %4869 = shalt.err (!%p4866_p3)
}
  0x69   : > { %s5126_s1 = smov [#allocation9]   ;;  %s5127_s27 = smov [#allocation10]  }
  0x6a   : > { %4648 = dma.hbm_to_smem (!%p5248_p6), %s6046_s2, 16, %s5126_s1, [#allocation6]  }
  0x6b   : > { %s310_s28 = sshll.u32 %s5127_s27, 4  ;;  %s5128_s29 = smov [#allocation13]   ;;  %s311_s28 = int_to_ptr.vmem [resolvable:$true] %s310_s28 }
  0x6c   : > { %s335_s12 = sshll.u32 %s5128_s29, 4  ;;  %s4870_s30 = scalar_lea.hbm %s6021_s3, 576  ;;  %s5343_s12 = int_to_ptr.vmem [resolvable:$true] %s335_s12 }
  0x6d   : > { %p4871_p10 = scmp.ne.s32.totalorder %s6021_s3, %s4870_s30  ;;  %p4877_p13 = scmp.lt.u32.totalorder %s4870_s30, %s6021_s3 }
  0x6f   : > { %p4873_p11 = pnand %p4871_p10, %p5262_p8 }
  0x71   : > { %p4874_p12 = pneg %p4873_p11 }
  0x73   : > { %p4879_p0 = pnand %p4877_p13, %p4874_p12 }
  0x75   : > { %4882 = shalt.err (!%p4879_p0)
}
  0x76   : > { %s4883_s26 = scalar_lea.vmem %s311_s28, 576  ;;  %p4891_p9 = scmp.lt.s32.totalorder %s311_s28, %s311_s28 }
  0x77   : > { %p4884_p2 = scmp.ne.s32.totalorder %s311_s28, %s4883_s26  ;;  %p4892_p4 = scmp.lt.s32.totalorder %s4883_s26, %s4883_s26 }
  0x79   : > { %p4886_p5 = pnand %p4884_p2, %p5262_p8  ;;  %p4893_p1 = por %p4892_p4, %p4891_p9 }
  0x7b   : > { %p4887_p7 = pneg %p4886_p5 }
  0x7d   : > { %p4894_p3 = pnand %p4893_p1, %p4887_p7 }
  0x7f   : > { %4897 = shalt.err (!%p4894_p3)
}
  0x80   : > { %s6047_s18 = smov 64   ;;  %s4898_s30 = scalar_lea.hbm %s6023_s5, 64 }
  0x81   : > { %4651 = dma.hbm_to_vmem [thread:$0]  (!%p5248_p6), %s6021_s3, 576, %s311_s28, [#allocation8], %s6047_s18, %s6047_s18, %s5125_s24  }
  0x82   : > { %p4899_p10 = scmp.ne.s32.totalorder %s6023_s5, %s4898_s30  ;;  %p4905_p13 = scmp.lt.u32.totalorder %s4898_s30, %s6023_s5 }
  0x84   : > { %p4901_p11 = pnand %p4899_p10, %p5262_p8 }
  0x86   : > { %p4902_p12 = pneg %p4901_p11 }
  0x88   : > { %p4907_p0 = pnand %p4905_p13, %p4902_p12 }
  0x8a   : > { %4910 = shalt.err (!%p4907_p0)
}
  0x8b   : > { %s4911_s24 = scalar_lea.vmem %s5343_s12, 64  ;;  %p4919_p9 = scmp.lt.s32.totalorder %s5343_s12, %s5343_s12 }
  0x8c   : > { %p4912_p2 = scmp.ne.s32.totalorder %s5343_s12, %s4911_s24  ;;  %p4920_p4 = scmp.lt.s32.totalorder %s4911_s24, %s4911_s24 }
  0x8e   : > { %p4914_p5 = pnand %p4912_p2, %p5262_p8  ;;  %p4921_p1 = por %p4920_p4, %p4919_p9 }
  0x90   : > { %p4915_p7 = pneg %p4914_p5 }
  0x92   : > { %p4922_p3 = pnand %p4921_p1, %p4915_p7 }
  0x94   : > { %4925 = shalt.err (!%p4922_p3)
}
  0x95   : > { %4657 = dma.hbm_to_vmem [thread:$0]  (!%p5248_p6), %s6023_s5, 64, %s5343_s12, [#allocation12]  }
  0x96   : > { %s4926_s17 = scalar_lea.hbm %s6024_s6, 16 }
  0x97   : > { %p4927_p10 = scmp.ne.s32.totalorder %s6024_s6, %s4926_s17  ;;  %p4933_p13 = scmp.lt.u32.totalorder %s4926_s17, %s6024_s6 }
  0x99   : > { %p4929_p11 = pnand %p4927_p10, %p5262_p8 }
  0x9b   : > { %p4930_p12 = pneg %p4929_p11 }
  0x9d   : > { %p4935_p0 = pnand %p4933_p13, %p4930_p12 }
  0x9f   : > { %4938 = shalt.err (!%p4935_p0)
}
  0xa0   : > { %s5129_s1 = smov [#allocation14]   ;;  %s5130_s24 = smov [#allocation18]  }
  0xa1   : > { %4660 = dma.hbm_to_smem (!%p5248_p6), %s6024_s6, 16, %s5129_s1, [#allocation15]  }
  0xa2   : > { %s368_s28 = sshll.u32 %s5130_s24, 4  ;;  %s5131_s18 = smov [#allocation19]   ;;  %s369_s28 = int_to_ptr.vmem [resolvable:$true] %s368_s28 }
  0xa3   : > { %s379_s27 = sshll.u32 %s5131_s18, 4  ;;  %s4939_s30 = scalar_lea.hbm %s6026_s8, 64  ;;  %s380_s27 = int_to_ptr.vmem [resolvable:$true] %s379_s27 }
  0xa4   : > { %p4940_p2 = scmp.ne.s32.totalorder %s6026_s8, %s4939_s30  ;;  %p4946_p9 = scmp.lt.u32.totalorder %s4939_s30, %s6026_s8 }
  0xa6   : > { %p4942_p5 = pnand %p4940_p2, %p5262_p8 }
  0xa8   : > { %p4943_p7 = pneg %p4942_p5 }
  0xaa   : > { %p4948_p4 = pnand %p4946_p9, %p4943_p7 }
  0xac   : > { %4951 = shalt.err (!%p4948_p4)
}
  0xad   : > { %s4952_s1 = scalar_lea.vmem %s369_s28, 64  ;;  %p4960_p11 = scmp.lt.s32.totalorder %s369_s28, %s369_s28 }
  0xae   : > { %p4953_p1 = scmp.ne.s32.totalorder %s369_s28, %s4952_s1  ;;  %p4961_p12 = scmp.lt.s32.totalorder %s4952_s1, %s4952_s1 }
  0xb0   : > { %p4955_p3 = pnand %p4953_p1, %p5262_p8  ;;  %p4962_p13 = por %p4961_p12, %p4960_p11 }
  0xb2   : > { %p4956_p10 = pneg %p4955_p3 }
  0xb4   : > { %p4963_p0 = pnand %p4962_p13, %p4956_p10 }
  0xb6   : > { %4966 = shalt.err (!%p4963_p0)
}
  0xb7   : > { %4666 = dma.hbm_to_vmem [thread:$0]  (!%p5248_p6), %s6026_s8, 64, %s369_s28, [#allocation17]  }
  0xb8   : > { %s4967_s21 = scalar_lea.hbm %s6027_s9, 64 }
  0xb9   : > { %p4968_p2 = scmp.ne.s32.totalorder %s6027_s9, %s4967_s21  ;;  %p4974_p9 = scmp.lt.u32.totalorder %s4967_s21, %s6027_s9 }
  0xbb   : > { %p4970_p5 = pnand %p4968_p2, %p5262_p8 }
  0xbd   : > { %p4971_p7 = pneg %p4970_p5 }
  0xbf   : > { %p4976_p4 = pnand %p4974_p9, %p4971_p7 }
  0xc1   : > { %4979 = shalt.err (!%p4976_p4)
}
  0xc2   : > { %s4980_s12 = scalar_lea.vmem %s380_s27, 64  ;;  %p4988_p11 = scmp.lt.s32.totalorder %s380_s27, %s380_s27 }
  0xc3   : > { %p4981_p1 = scmp.ne.s32.totalorder %s380_s27, %s4980_s12  ;;  %p4989_p12 = scmp.lt.s32.totalorder %s4980_s12, %s4980_s12 }
  0xc5   : > { %p4983_p3 = pnand %p4981_p1, %p5262_p8  ;;  %p4990_p13 = por %p4989_p12, %p4988_p11 }
  0xc7   : > { %p4984_p10 = pneg %p4983_p3 }
  0xc9   : > { %p4991_p0 = pnand %p4990_p13, %p4984_p10 }
  0xcb   : > { %4994 = shalt.err (!%p4991_p0)
}
  0xcc   : > { %4669 = dma.hbm_to_vmem [thread:$0]  (!%p5248_p6), %s6027_s9, 64, %s380_s27, [#allocation20]  }
  0xcd   : > { %s4380_s11 = sadd.s32 4294967294, %s5119_s16   ;;  %s5443_s23 = sadd.s32 1, %s5119_s16  }
  0xce   : > { %s39_s26 = sadd.s32 1, %s5115_s15  ;;  %s36_s24 = ssub.s32 %s5119_s16, %s5443_s23 }
  0xcf   : > { %p46_p8 = scmp.ne.s32.totalorder %s5115_s15, %s5111_s14  ;;  %p37_p2 = scmp.eq.s32.totalorder %s36_s24, 0 }
  0xd0   : > { %p47_p5 = scmp.eq.s32.totalorder %s5119_s16, 0  ;;  %p52_p7 = scmp.ne.s32.totalorder %s5111_s14, %s5107_s13 }
  0xd1   : > { %p265_p9 = scmp.eq.s32.totalorder %s5232_s19, 1  ;;  %p6048_p1 = scmp.eq.s32.totalorder %s5232_s19, 0 }
  0xd2   : > { %s5455_s18 = scalar_select %p37_p2, %s5115_s15, %s39_s26  }
  0xd3   : > { %p48_p4 = por %p47_p5, %p46_p8  ;;  %p5459_p3 = por %p6048_p1, %p52_p7 }
  0xd4   : > { %p5463_p6 = por %p265_p9, %p46_p8  ;;  %p271_p10 = scmp.eq.s32.totalorder %s4380_s11, 1 }
  0xd5   : > { %p4687_p11 = scmp.lt.s32.totalorder %s5119_s16, 2  ;;  %s390_s21 = sand.u32 1, %s5115_s15  }
  0xd6   : > { %s6050_s27 = scalar_select %p5463_p6, 1, 0 }
  0xd7   : > { %p5469_p12 = por %p271_p10, %p52_p7  ;;  %s4392_s17 = sshll.u32 %s390_s21, 4 }
  0xd8   : > { %s4536_s22 = sshll.u32 %s5119_s16, 8  ;;  %s394_s1 = scalar_lea.vmem [#allocation3], %s4392_s17 }
  0xd9   : > { %s6051_s30 = scalar_select %p5469_p12, 1, 0 }
  0xda   : > { %s5477_s28 = scalar_lea.hbm %s6018_s0, %s4536_s22  ;;  %s402_s26 = sshll.u32 %s394_s1, 4  ;;  %s5483_s26 = int_to_ptr.vmem [resolvable:$true] %s402_s26 }
  0xdb   : > { %p5479_p13 = pnand %p4687_p11, %p48_p4  ;;  %s391_s24 = scalar_lea.sflag [#allocation4], %s390_s21 }
  0xdc   : > { %s4995_s2 = scalar_lea.hbm %s5477_s28, 256  ;;  %s5000_s25 = scalar_lea.hbm %s6018_s0, 512 }
  0xdd   : > { %p4996_p0 = scmp.ne.s32.totalorder %s5477_s28, %s4995_s2  ;;  %p4997_p8 = pneg %p5479_p13 }
  0xde   : > { %p5001_p7 = scmp.lt.u32.totalorder %s5477_s28, %s6018_s0  ;;  %p5002_p9 = scmp.lt.u32.totalorder %s5000_s25, %s4995_s2 }
  0xdf   : > { %p4998_p2 = pnand %p4997_p8, %p4996_p0  ;;  %p5004_p1 = scmp.lt.u32.totalorder %s4995_s2, %s5477_s28 }
  0xe0   : > { %p5003_p4 = por %p5002_p9, %p5001_p7 }
  0xe1   : > { %p4999_p5 = pneg %p4998_p2 }
  0xe2   : > { %p5005_p10 = por %p5004_p1, %p5003_p4 }
  0xe4   : > { %p5006_p11 = pnand %p5005_p10, %p4999_p5 }
  0xe6   : > { %5009 = shalt.err (!%p5006_p11)
}
  0xe7   : > { %s5010_s21 = scalar_lea.vmem %s5483_s26, 256  ;;  %s5132_s22 = smov [#allocation3]  }
  0xe8   : > { %p5011_p0 = scmp.ne.s32.totalorder %s5483_s26, %s5010_s21  ;;  %s5015_s17 = sshll.u32 %s5132_s22, 4  ;;  %s5016_s17 = int_to_ptr.vmem [resolvable:$false] %s5015_s17 }
  0xe9   : > { %s5017_s12 = scalar_lea.vmem %s5016_s17, 512  ;;  %p5018_p6 = scmp.lt.s32.totalorder %s5483_s26, %s5016_s17 }
  0xea   : > { %p5013_p2 = pnand %p5011_p0, %p4997_p8  ;;  %p5019_p7 = scmp.lt.s32.totalorder %s5017_s12, %s5010_s21 }
  0xec   : > { %p5014_p12 = pneg %p5013_p2  ;;  %p5020_p9 = por %p5019_p7, %p5018_p6 }
  0xee   : > { %p5021_p4 = pnand %p5020_p9, %p5014_p12 }
  0xf0   : > { %5024 = shalt.err (!%p5021_p4)
}
  0xf1   : > { %4673 = dma.hbm_to_vmem [thread:$0]  (!%p5479_p13), %s5477_s28, 256, %s5483_s26, %s391_s24  }
  0xf2   : > { %p6053_p5 = scmp.ne.s32.totalorder %s6042_s20, 0 }
  0xf3   : > { %s5513_s2 = sand.u32 (!%p6053_p5), 1, %s5111_s14  }
  0xf4   : > { %411 = sbr.rel (%p6053_p5) target bundleno = 2718 (0xa9e), region = 60  ;;  %s6033_s25 = sshll.u32 (!%p6053_p5), %s5513_s2, 4 }
  0xf5   : > { %s414_s1 = scalar_lea.sflag (!%p6053_p5), [#allocation4], %s5513_s2  ;;  %s417_s21 = scalar_lea.vmem (!%p6053_p5), [#allocation3], %s6033_s25 }
  0xfb   : > { %5070 = dma.done.wait (%p5459_p3), %s414_s1, 256  }
  0xfc   : > { %5072 = vsyncadd (%p5459_p3), %s414_s1, 4294967040  ;;  %p6054_p6 = scmp.eq.s32.totalorder %s5232_s19, 0 }
  0xfe   : > { %5074 = dma.done.wait (%p6054_p6), [#allocation8], 64   ;;  %p6055_p12 = pmov %p6054_p6 }
  0xff   : > { %p6056_p13 = pmov %p6054_p6 }
 0x100   : > { %5076 = vsyncadd (%p6055_p12), [#allocation8], 4294967232 }
 0x101   : > { %5078 = dma.done.wait (%p6056_p13), [#allocation6], 16   ;;  %p6057_p8 = pmov %p6054_p6 }
 0x102   : > { %p6058_p1 = pmov %p6054_p6 }
 0x103   : > { %5080 = vsyncadd (%p6057_p8), [#allocation6], 4294967280 }
 0x104   : > { %5082 = dma.done.wait (%p6058_p1), [#allocation8], 576   ;;  %p6059_p10 = pmov %p6058_p1 }
 0x105   : > { %p6060_p3 = pmov %p6058_p1 }
 0x106   : > { %5084 = vsyncadd (%p6059_p10), [#allocation8], 4294966720 }
 0x107   : > { %5086 = dma.done.wait (%p6060_p3), [#allocation12], 128   ;;  %p6061_p11 = pmov %p6058_p1 }
 0x108   : > { %p6062_p0 = pmov %p6058_p1 }
 0x109   : > { %5088 = vsyncadd (%p6061_p11), [#allocation12], 4294967168 }
 0x10a   : > { %5090 = dma.done.wait (%p6062_p0), [#allocation15], 16   ;;  %p6063_p2 = pmov %p6062_p0 }
 0x10b   : > { %p6064_p7 = pmov %p6062_p0 }
 0x10c   : > { %5092 = vsyncadd (%p6063_p2), [#allocation15], 4294967280 }
 0x10d   : > { %5094 = dma.done.wait (%p6064_p7), [#allocation17], 640   ;;  %p6065_p9 = pmov %p6062_p0 }
 0x10e   : > { %p6066_p4 = pmov %p6062_p0 }
 0x10f   : > { %5096 = vsyncadd (%p6065_p9), [#allocation17], 4294966656 }
 0x110   : > { %5098 = dma.done.wait (%p6066_p4), [#allocation20], 64   ;;  %p6067_p5 = pmov %p6062_p0 }
 0x112   : > { %5100 = vsyncadd (%p6067_p5), [#allocation20], 4294967232 }
 0x113   : > { %458 = sfence }
 0x114   : > { %v5551_v0 = vld [vmem:[%s417_s21] sm:$0xff]  ;;  %v493_v1 = vld [vmem:[%s417_s21 + $0x8] sm:$0xff]  ;;  %vm495_vm0 = vcmask 1043456   ;;  %vm496_vm1 = vcmask 818180   ;;  %s4408_s20 = sld [smem:[#allocation9 + $0x2]]  ;;  %s4407_s29 = sld [smem:[#allocation9 + $0x1]]  ;;  %v668_v17 = vlaneseq }
 0x115   : > { %494 = vst [vmem:[#allocation2] sm:$0xff] %v5551_v0  ;;  %vm497_vm2 = vmor %vm496_vm1, %vm495_vm0  ;;  %s4409_s28 = sld [smem:[#allocation9 + $0x3]]  ;;  %s4410_s26 = sld [smem:[#allocation9 + $0x4]]  ;;  %v491_v29 = vld [vmem:[#allocation7] sm:$0xf]  ;;  %vm540_vm3 = vcmask 1031168  }
 0x116   : > { %498 = vst.msk [vmem:[#allocation2 + $0x8] sm:$0xff] %vm497_vm2, %v493_v1  ;;  %s5133_s11 = smov 126   ;;  %s5134_s24 = smov 127   ;;  %v669_v21 = vshrl.u32 %v668_v17, 7  ;;  %vm520_vm4 = vcmask 1039360   ;;  %vm560_vm5 = vcmask 883712  }
 0x117   : > { %s4411_s22 = sld [smem:[#allocation9 + $0x5]]  ;;  %s5135_s17 = smov 108   ;;  %vm580_vm6 = vcmask 875520   ;;  %vm600_vm7 = vcmask 867328   ;;  %vm620_vm8 = vcmask 719872   ;;  %vm640_vm9 = vcmask 711680  }
 0x118   : > { %s4412_s12 = sld [smem:[#allocation9 + $0x6]]  ;;  %s5136_s1 = smov 107   ;;  %v678_v25 = vsub.s32 2, %v669_v21  ;;  %v682_v26 = vsub.s32 3, %v669_v21  ;;  %v670_v30 = vsub.s32 0, %v669_v21  ;;  %v674_v31 = vsub.s32 1, %v669_v21 }
 0x119   : > { %s4413_s21 = sld [smem:[#allocation9 + $0x7]]  ;;  %vm660_vm10 = vcmask 703488   ;;  %vm696_vm11 = vcmask 171008   ;;  %vm717_vm12 = vcmask 1043792   ;;  %vm718_vm13 = vcmask 1047556   ;;  %s5146_s25 = smov 46  }
 0x11a   : > { %v528_v2 = vstv %s4408_s20  ;;  %v508_v4 = vstv %s4407_s29  ;;  %s4414_s20 = sld [smem:[#allocation9 + $0x8]]  ;;  %s5137_s29 = smov 106   ;;  %v5585_v33 = vrot.slane %v491_v29, %v678_v25  ;;  %v5587_v34 = vrot.slane %v491_v29, %v682_v26  ;;  %vm5640_vm15 = vmor %vm718_vm13, %vm717_vm12 }
 0x11b   : > { %v529_v3 = vmul.f32 %v528_v2, %v5551_v0  ;;  %v509_v5 = vmul.f32 %v508_v4, %v5551_v0  ;;  %v548_v6 = vstv %s4409_s28  ;;  %v568_v10 = vstv %s4410_s26  ;;  %s5138_s28 = smov 88   ;;  %s6038_s26 = smov 87  }
 0x11c   : > { %v549_v9 = vmul.f32 %v548_v6, %v5551_v0  ;;  %v569_v12 = vmul.f32 %v568_v10, %v5551_v0  ;;  %v5591_v36 = vrot.slane %v491_v29, %v670_v30  ;;  %v5593_v37 = vrot.slane %v491_v29, %v674_v31  ;;  %p6076_p12 = scmp.ne.s32.totalorder %s6050_s27, 0 }
 0x11d   : > { %v5557_v7 = vld [vmem:[#allocation2 + $0x8] sm:$0xff]  ;;  %533 = vrot.lane.b32.xlu1 %v529_v3, %s5133_s11  ;;  %513 = vrot.lane.b32.xlu0 %v509_v5, %s5134_s24  ;;  %v588_v15 = vstv %s4411_s22  ;;  %s6036_s22 = smov 86   ;;  %v689_v38 = vcombine.low %v5585_v33, %v5587_v34  ;;  %vm721_vm14 = vcmask 474116   ;;  %vm744_vm2 = vcmask 31744  }
 0x11e   : > { %v530_v8 = vmul.f32 %v528_v2, %v5557_v7  ;;  %v550_v11 = vmul.f32 %v548_v6, %v5557_v7  ;;  %v570_v13 = vmul.f32 %v568_v10, %v5557_v7  ;;  %v510_v14 = vmul.f32 %v508_v4, %v5557_v7  ;;  %vm5646_vm1 = vmor %vm721_vm14, %vm495_vm0 }
 0x11f   : > { %v590_v16 = vmul.f32 %v588_v15, %v5557_v7  ;;  %v589_v18 = vmul.f32 %v588_v15, %v5551_v0  ;;  %v608_v19 = vstv %s4412_s12  ;;  %v628_v23 = vstv %s4413_s21  ;;  %s6034_s12 = smov 21   ;;  %s499_s21 = sld [smem:[#allocation9]] }
 0x120   : > { %v610_v20 = vmul.f32 %v608_v19, %v5557_v7  ;;  %v609_v22 = vmul.f32 %v608_v19, %v5551_v0  ;;  %v630_v24 = vmul.f32 %v628_v23, %v5557_v7  ;;  %v629_v27 = vmul.f32 %v628_v23, %v5551_v0 }
 0x121   : > { %535 = vrot.lane.b32.xlu1 %v530_v8, %s5133_s11  ;;  %553 = vrot.lane.b32.xlu0 %v549_v9, %s5135_s17  ;;  %v648_v28 = vstv %s4414_s20  ;;  %v688_v39 = vcombine.low %v5591_v36, %v5593_v37  ;;  %s5143_s20 = smov 124   ;;  %vm1067_vm12 = vcmask 1014784   ;;  %vm1596_vm13 = vcmask 687104  }
 0x122   : > { %v650_v32 = vmul.f32 %v648_v28, %v5557_v7  ;;  %v649_v35 = vmul.f32 %v648_v28, %v5551_v0  ;;  %vm1773_vm14 = vcmask 392192  }
 0x125   : > { %555 = vrot.lane.b32.xlu1 %v550_v11, %s5135_s17  ;;  %573 = vrot.lane.b32.xlu0 %v569_v12, %s5136_s1  ;;  %v502_v46 = vstv %s499_s21  ;;  %s5144_s21 = smov 84  }
 0x126   : > { %v504_v49 = vmul.f32 %v502_v46, %v5557_v7  ;;  %v503_v51 = vmul.f32 %v502_v46, %v5551_v0 }
 0x129   : > { %575 = vrot.lane.b32.xlu1 %v570_v13, %s5136_s1  ;;  %515 = vrot.lane.b32.xlu0 %v510_v14, %s5134_s24 }
 0x12d   : > { %595 = vrot.lane.b32.xlu1 %v590_v16, %s5137_s29  ;;  %593 = vrot.lane.b32.xlu0 %v589_v18, %s5137_s29 }
 0x131   : > { %615 = vrot.lane.b32.xlu1 %v610_v20, %s5138_s28  ;;  %613 = vrot.lane.b32.xlu0 %v609_v22, %s5138_s28 }
 0x135   : > { %635 = vrot.lane.b32.xlu1 %v630_v24, %s6038_s26  ;;  %633 = vrot.lane.b32.xlu0 %v629_v27, %s6038_s26  ;;  %s5791_s26 = sld [smem:[#allocation14 + $0x6]] }
 0x139   : > { %655 = vrot.lane.b32.xlu1 %v650_v32, %s6036_s22  ;;  %653 = vrot.lane.b32.xlu0 %v649_v35, %s6036_s22 }
 0x13d   : > { %692 = vrot.lane.b32.xlu1 %v689_v38, %s6034_s12  ;;  %690 = vrot.lane.b32.xlu0 %v688_v39, %s6034_s12 }
 0x18f   : > { %v534_v40 = vpop.permute.xlu1 %533  ;;  %v514_v41 = vpop.permute.xlu0 %513 }
 0x190   : > { %v537_v52 = vrot.slane %v534_v40, 4  ;;  %v517_v53 = vrot.slane %v514_v41, 4 }
 0x193   : > { %v536_v42 = vpop.permute.xlu1 %535  ;;  %v554_v43 = vpop.permute.xlu0 %553 }
 0x194   : > { %v538_v47 = vrot.slane %v536_v42, 4  ;;  %v557_v56 = vrot.slane %v554_v43, 4 }
 0x196   : > { %v539_v57 = vsel %vm495_vm0, %v537_v52, %v538_v47  ;;  %v542_v62 = vsel %vm540_vm3, %v536_v42, %v538_v47 }
 0x197   : > { %v556_v44 = vpop.permute.xlu1 %555  ;;  %v574_v45 = vpop.permute.xlu0 %573  ;;  %v541_v7 = vsel %vm540_vm3, %v534_v40, %v539_v57 }
 0x198   : > { %v558_v54 = vrot.slane %v556_v44, 4  ;;  %v577_v63 = vrot.slane %v574_v45, 4 }
 0x19a   : > { %v559_v3 = vsel %vm495_vm0, %v557_v56, %v558_v54  ;;  %v562_v9 = vsel %vm560_vm5, %v556_v44, %v558_v54 }
 0x19b   : > { %v576_v48 = vpop.permute.xlu1 %575  ;;  %v516_v50 = vpop.permute.xlu0 %515  ;;  %v561_v14 = vsel %vm560_vm5, %v554_v43, %v559_v3 }
 0x19c   : > { %v518_v55 = vrot.slane %v516_v50, 4  ;;  %v578_v58 = vrot.slane %v576_v48, 4 }
 0x19e   : > { %v519_v59 = vsel %vm495_vm0, %v517_v53, %v518_v55  ;;  %v522_v60 = vsel %vm520_vm4, %v516_v50, %v518_v55  ;;  %v579_v10 = vsel %vm495_vm0, %v577_v63, %v578_v58  ;;  %v582_v17 = vsel %vm580_vm6, %v576_v48, %v578_v58 }
 0x19f   : > { %v596_v61 = vpop.permute.xlu1 %595  ;;  %v521_v1 = vsel %vm520_vm4, %v514_v41, %v519_v59  ;;  %v526_v0 = vadd.f32 %v522_v60, %v504_v49  ;;  %v594_v2 = vpop.permute.xlu0 %593  ;;  %v581_v22 = vsel %vm580_vm6, %v574_v45, %v579_v10 }
 0x1a0   : > { %v525_v4 = vadd.f32 %v521_v1, %v503_v51  ;;  %v598_v5 = vrot.slane %v596_v61, 4  ;;  %v597_v6 = vrot.slane %v594_v2, 4 }
 0x1a1   : > { %v546_v8 = vadd.f32 %v542_v62, %v526_v0 }
 0x1a2   : > { %v545_v11 = vadd.f32 %v541_v7, %v525_v4  ;;  %v599_v19 = vsel %vm495_vm0, %v597_v6, %v598_v5  ;;  %v602_v26 = vsel %vm600_vm7, %v596_v61, %v598_v5 }
 0x1a3   : > { %v616_v12 = vpop.permute.xlu1 %615  ;;  %v566_v13 = vadd.f32 %v562_v9, %v546_v8  ;;  %v614_v16 = vpop.permute.xlu0 %613  ;;  %v601_v27 = vsel %vm600_vm7, %v594_v2, %v599_v19  ;;  %v5142_v9 = vmov 0.0   ;;  %v728_v19 = vld [vmem:[#allocation10 + $0x4] sm:$0xf] }
 0x1a4   : > { %v618_v15 = vrot.slane %v616_v12, 4  ;;  %v565_v18 = vadd.f32 %v561_v14, %v545_v11  ;;  %v617_v20 = vrot.slane %v614_v16, 4  ;;  %820 = vmatprep.mubr.f32.mxu0 %v5142_v9  ;;  %891 = vmatprep.mubr.f32.mxu1 %v5142_v9 }
 0x1a5   : > { %v586_v21 = vadd.f32 %v582_v17, %v566_v13 }
 0x1a6   : > { %v585_v23 = vadd.f32 %v581_v22, %v565_v18  ;;  %v619_v24 = vsel %vm495_vm0, %v617_v20, %v618_v15  ;;  %v622_v41 = vsel %vm620_vm8, %v616_v12, %v618_v15 }
 0x1a7   : > { %v636_v25 = vpop.permute.xlu1 %635  ;;  %v634_v29 = vpop.permute.xlu0 %633  ;;  %v606_v30 = vadd.f32 %v602_v26, %v586_v21  ;;  %v621_v35 = vsel %vm620_vm8, %v614_v16, %v619_v24 }
 0x1a8   : > { %v638_v28 = vrot.slane %v636_v25, 4  ;;  %v605_v31 = vadd.f32 %v601_v27, %v585_v23  ;;  %v637_v32 = vrot.slane %v634_v29, 4  ;;  %v726_v27 = vld [vmem:[#allocation10] sm:$0xf] }
 0x1a9   : > { %v626_v45 = vadd.f32 %v622_v41, %v606_v30 }
 0x1aa   : > { %v625_v38 = vadd.f32 %v621_v35, %v605_v31  ;;  %v639_v39 = vsel %vm495_vm0, %v637_v32, %v638_v28  ;;  %v642_v47 = vsel %vm640_vm9, %v636_v25, %v638_v28 }
 0x1ab   : > { %v656_v40 = vpop.permute.xlu1 %655  ;;  %v641_v42 = vsel %vm640_vm9, %v634_v29, %v639_v39  ;;  %v654_v44 = vpop.permute.xlu0 %653  ;;  %v646_v55 = vadd.f32 %v642_v47, %v626_v45  ;;  %v1054_v39 = vld [vmem:[#allocation10 + $0x8] sm:$0xf]  ;;  %v1231_v47 = vld [vmem:[#allocation10 + $0xc] sm:$0xf] }
 0x1ac   : > { %v658_v43 = vrot.slane %v656_v40, 4  ;;  %v657_v46 = vrot.slane %v654_v44, 4  ;;  %v645_v48 = vadd.f32 %v641_v42, %v625_v38 }
 0x1ae   : > { %v659_v49 = vsel %vm495_vm0, %v657_v46, %v658_v43  ;;  %v662_v51 = vsel %vm660_vm10, %v656_v40, %v658_v43 }
 0x1af   : > { %v693_v50 = vpop.permute.xlu1 %692  ;;  %v661_v52 = vsel %vm660_vm10, %v654_v44, %v659_v49  ;;  %v691_v54 = vpop.permute.xlu0 %690  ;;  %v666_v58 = vadd.f32 %v662_v51, %v646_v55  ;;  %v1407_v55 = vld [vmem:[#allocation10 + $0x10] sm:$0xf] }
 0x1b0   : > { %v695_v53 = vrot.slane %v693_v50, 4  ;;  %v665_v56 = vadd.f32 %v661_v52, %v645_v48  ;;  %v694_v57 = vrot.slane %v691_v54, 4 }
 0x1b2   : > { %v5630_v59 = vsel %vm696_vm11, %v694_v57, %v691_v54  ;;  %v698_v60 = vsel %vm495_vm0, %v694_v57, %v695_v53 }
 0x1b3   : > { %v702_v61 = vmul.f32 %v5630_v59, %v665_v56  ;;  %v5635_v62 = vsel %vm696_vm11, %v698_v60, %v693_v50 }
 0x1b4   : > { %v703_v63 = vmul.f32 %v5635_v62, %v666_v58 }
 0x1b5   : > { %706 = vrot.lane.b32.xlu0 %v702_v61, %s6034_s12 }
 0x1b6   : > { %708 = vrot.lane.b32.xlu1 %v703_v63, %s6034_s12  ;;  %s5147_s12 = smov 44  }
 0x227   : > { %v707_v1 = vpop.permute.xlu0 %706 }
 0x228   : > { %v710_v2 = vrot.slane %v707_v1, 4  ;;  %v709_v3 = vpop.permute.xlu1 %708 }
 0x229   : > { %v711_v4 = vrot.slane %v709_v3, 4 }
 0x22a   : > { %v712_v5 = vsel %vm696_vm11, %v710_v2, %v707_v1 }
 0x22b   : > { %720 = vst.msk [vmem:[#allocation2] sm:$0xff] %vm5640_vm15, %v712_v5  ;;  %v713_v7 = vsel %vm495_vm0, %v710_v2, %v711_v4  ;;  %v1583_v2 = vld [vmem:[#allocation10 + $0x14] sm:$0xf] }
 0x22c   : > { %v714_v8 = vsel %vm696_vm11, %v713_v7, %v709_v3 }
 0x22d   : > { %723 = vst.msk [vmem:[#allocation2 + $0x8] sm:$0xff] %vm5646_vm1, %v714_v8 }
 0x232   : > { %v724_v10 = vld [vmem:[#allocation2] sm:$0xff] }
 0x233   : > { %v731_v11 = vcombine.high %v724_v10, %v724_v10 }
 0x234   : > { %v725_v12 = vld [vmem:[#allocation2 + $0x8] sm:$0xff] }
 0x235   : > { %737 = vrot.lane.b32.xlu1 %v725_v12, %s5133_s11  ;;  %735 = vrot.lane.b32.xlu0 %v731_v11, %s5133_s11  ;;  %v732_v13 = vcombine.high %v725_v12, %v725_v12 }
 0x239   : > { %739 = vrot.lane.b32.xlu1 %v732_v13, %s5133_s11  ;;  %733 = vrot.lane.b32.xlu0 %v724_v10, %s5133_s11 }
 0x23d   : > { %1063 = vrot.lane.b32.xlu1 %v725_v12, %s5143_s20  ;;  %1061 = vrot.lane.b32.xlu0 %v731_v11, %s5143_s20 }
 0x241   : > { %1065 = vrot.lane.b32.xlu1 %v732_v13, %s5143_s20  ;;  %1059 = vrot.lane.b32.xlu0 %v724_v10, %s5143_s20  ;;  %s5145_s20 = smov 48  }
 0x245   : > { %1240 = vrot.lane.b32.xlu1 %v725_v12, %s5138_s28  ;;  %1238 = vrot.lane.b32.xlu0 %v731_v11, %s5138_s28 }
 0x249   : > { %1242 = vrot.lane.b32.xlu1 %v732_v13, %s5138_s28  ;;  %1236 = vrot.lane.b32.xlu0 %v724_v10, %s5138_s28 }
 0x24d   : > { %1416 = vrot.lane.b32.xlu1 %v725_v12, %s6036_s22  ;;  %1414 = vrot.lane.b32.xlu0 %v731_v11, %s6036_s22 }
 0x251   : > { %1418 = vrot.lane.b32.xlu1 %v732_v13, %s6036_s22  ;;  %1412 = vrot.lane.b32.xlu0 %v724_v10, %s6036_s22  ;;  %s4470_s22 = sld [smem:[#allocation14 + $0x2]] }
 0x255   : > { %1592 = vrot.lane.b32.xlu1 %v725_v12, %s5144_s21  ;;  %1590 = vrot.lane.b32.xlu0 %v731_v11, %s5144_s21 }
 0x259   : > { %1594 = vrot.lane.b32.xlu1 %v732_v13, %s5144_s21  ;;  %1588 = vrot.lane.b32.xlu0 %v724_v10, %s5144_s21  ;;  %s4469_s21 = sld [smem:[#allocation14 + $0x1]] }
 0x25d   : > { %1769 = vrot.lane.b32.xlu1 %v725_v12, %s5145_s20  ;;  %1767 = vrot.lane.b32.xlu0 %v731_v11, %s5145_s20 }
 0x261   : > { %1771 = vrot.lane.b32.xlu1 %v732_v13, %s5145_s20  ;;  %1765 = vrot.lane.b32.xlu0 %v724_v10, %s5145_s20  ;;  %s5778_s20 = sld [smem:[#allocation14 + $0x4]] }
 0x265   : > { %1946 = vrot.lane.b32.xlu1 %v725_v12, %s5146_s25  ;;  %1944 = vrot.lane.b32.xlu0 %v731_v11, %s5146_s25 }
 0x269   : > { %1948 = vrot.lane.b32.xlu1 %v732_v13, %s5146_s25  ;;  %1942 = vrot.lane.b32.xlu0 %v724_v10, %s5146_s25  ;;  %s5149_s25 = smov 42  }
 0x26d   : > { %2123 = vrot.lane.b32.xlu1 %v725_v12, %s5147_s12  ;;  %2121 = vrot.lane.b32.xlu0 %v731_v11, %s5147_s12 }
 0x271   : > { %2125 = vrot.lane.b32.xlu1 %v732_v13, %s5147_s12  ;;  %2119 = vrot.lane.b32.xlu0 %v724_v10, %s5147_s12  ;;  %s5774_s12 = sld [smem:[#allocation14 + $0x3]] }
 0x2a7   : > { %v738_v14 = vpop.permute.xlu1 %737  ;;  %v736_v15 = vpop.permute.xlu0 %735 }
 0x2a8   : > { %v742_v16 = vsel %vm540_vm3, %v736_v15, %v738_v14 }
 0x2a9   : > { %4415 = vmatprep.subr.msk.mxu0 %vm495_vm0, %v742_v16 }
 0x2ab   : > { %v740_v17 = vpop.permute.xlu1 %739  ;;  %v734_v18 = vpop.permute.xlu0 %733 }
 0x2ac   : > { %4418 = vmatprep.subr.msk.mxu1 %vm495_vm0, %v740_v17  ;;  %v741_v20 = vsel %vm540_vm3, %v734_v18, %v736_v15  ;;  %v743_v21 = vsel %vm540_vm3, %v738_v14, %v740_v17 }
 0x2ad   : > { %4416 = vmatpush1.msk.msra.mxu0 %vm495_vm0, %v741_v20  ;;  %4419 = vmatpush1.msk.msra.mxu1 %vm495_vm0, %v743_v21  ;;  %v1937_v20 = vld [vmem:[#allocation10 + $0x1c] sm:$0xf] }
 0x2ae   : > { %4417 = vmatmul.mubr.msk.f32.vlgmr.msra.gmra.mrb[0].mxu0 %vm744_vm2, %v728_v19  ;;  %4420 = vmatmul.mubr.msk.f32.vlgmr.msra.gmra.mrb[0].mxu1 %vm744_vm2, %v728_v19 }
 0x2af   : > { %4421 = vmatprep.subr.msk.mxu0 %vm495_vm0, %v731_v11  ;;  %4424 = vmatprep.subr.msk.mxu1 %vm495_vm0, %v732_v13  ;;  %v1064_v22 = vpop.permute.xlu1 %1063  ;;  %v1062_v23 = vpop.permute.xlu0 %1061 }
 0x2b0   : > { %4425 = vmatpush1.msk.msra.mxu1 %vm495_vm0, %v725_v12  ;;  %4422 = vmatpush1.msk.msra.mxu0 %vm495_vm0, %v724_v10  ;;  %v1069_v24 = vsel %vm1067_vm12, %v1062_v23, %v1064_v22  ;;  %v1760_v12 = vld [vmem:[#allocation10 + $0x18] sm:$0xf] }
 0x2b1   : > { %4427 = vmatprep.subr.msk.mxu0 %vm495_vm0, %v1069_v24  ;;  %973 = vmatprep.mubr.f32.mxu0 %v5142_v9 }
 0x2b2   : > { %1044 = vmatprep.mubr.f32.mxu1 %v5142_v9 }
 0x2b3   : > { %v1066_v25 = vpop.permute.xlu1 %1065  ;;  %v1060_v26 = vpop.permute.xlu0 %1059 }
 0x2b4   : > { %v1070_v28 = vsel %vm1067_vm12, %v1064_v22, %v1066_v25  ;;  %v1068_v29 = vsel %vm1067_vm12, %v1060_v26, %v1062_v23  ;;  %4430 = vmatprep.subr.msk.mxu1 %vm495_vm0, %v1066_v25  ;;  %vm1950_vm12 = vcmask 375808   ;;  %v2114_v23 = vld [vmem:[#allocation10 + $0x20] sm:$0xf] }
 0x2b6   : > { %4423 = vmatmul.mubr.msk.f32.vlgmr.msra.gmra.mrb[0].mxu0 %vm744_vm2, %v726_v27  ;;  %4426 = vmatmul.mubr.msk.f32.vlgmr.msra.gmra.mrb[0].mxu1 %vm744_vm2, %v726_v27 }
 0x2b7   : > { %4428 = vmatpush1.msk.msra.mxu0 %vm495_vm0, %v1068_v29  ;;  %4431 = vmatpush1.msk.msra.mxu1 %vm495_vm0, %v1070_v28  ;;  %v1241_v30 = vpop.permute.xlu1 %1240  ;;  %v1239_v31 = vpop.permute.xlu0 %1238 }
 0x2b8   : > { %v1245_v32 = vsel %vm620_vm8, %v1239_v31, %v1241_v30  ;;  %1146 = vmatprep.mubr.f32.mxu0 %v5142_v9  ;;  %1217 = vmatprep.mubr.f32.mxu1 %v5142_v9 }
 0x2b9   : > { %4433 = vmatprep.subr.msk.mxu0 %vm495_vm0, %v1245_v32 }
 0x2bb   : > { %v1243_v35 = vpop.permute.xlu1 %1242  ;;  %v1237_v38 = vpop.permute.xlu0 %1236 }
 0x2bc   : > { %v1246_v40 = vsel %vm620_vm8, %v1241_v30, %v1243_v35  ;;  %v1244_v41 = vsel %vm620_vm8, %v1237_v38, %v1239_v31  ;;  %4436 = vmatprep.subr.msk.mxu1 %vm495_vm0, %v1243_v35 }
 0x2be   : > { %4429 = vmatmul.mubr.msk.f32.vlgmr.msra.gmra.mrb[0].mxu0 %vm744_vm2, %v1054_v39  ;;  %4432 = vmatmul.mubr.msk.f32.vlgmr.msra.gmra.mrb[0].mxu1 %vm744_vm2, %v1054_v39 }
 0x2bf   : > { %4434 = vmatpush1.msk.msra.mxu0 %vm495_vm0, %v1244_v41  ;;  %4437 = vmatpush1.msk.msra.mxu1 %vm495_vm0, %v1246_v40  ;;  %v1417_v42 = vpop.permute.xlu1 %1416  ;;  %v1415_v43 = vpop.permute.xlu0 %1414 }
 0x2c0   : > { %v1421_v44 = vsel %vm660_vm10, %v1415_v43, %v1417_v42  ;;  %1322 = vmatprep.mubr.f32.mxu0 %v5142_v9  ;;  %1393 = vmatprep.mubr.f32.mxu1 %v5142_v9 }
 0x2c1   : > { %4439 = vmatprep.subr.msk.mxu0 %vm495_vm0, %v1421_v44 }
 0x2c3   : > { %v1419_v45 = vpop.permute.xlu1 %1418  ;;  %v1413_v46 = vpop.permute.xlu0 %1412 }
 0x2c4   : > { %v1422_v48 = vsel %vm660_vm10, %v1417_v42, %v1419_v45  ;;  %v1420_v49 = vsel %vm660_vm10, %v1413_v46, %v1415_v43  ;;  %4442 = vmatprep.subr.msk.mxu1 %vm495_vm0, %v1419_v45 }
 0x2c6   : > { %4435 = vmatmul.mubr.msk.f32.vlgmr.msra.gmra.mrb[0].mxu0 %vm744_vm2, %v1231_v47  ;;  %4438 = vmatmul.mubr.msk.f32.vlgmr.msra.gmra.mrb[0].mxu1 %vm744_vm2, %v1231_v47 }
 0x2c7   : > { %4440 = vmatpush1.msk.msra.mxu0 %vm495_vm0, %v1420_v49  ;;  %4443 = vmatpush1.msk.msra.mxu1 %vm495_vm0, %v1422_v48  ;;  %v1593_v50 = vpop.permute.xlu1 %1592  ;;  %v1591_v51 = vpop.permute.xlu0 %1590 }
 0x2c8   : > { %v1598_v52 = vsel %vm1596_vm13, %v1591_v51, %v1593_v50  ;;  %1498 = vmatprep.mubr.f32.mxu0 %v5142_v9  ;;  %1569 = vmatprep.mubr.f32.mxu1 %v5142_v9 }
 0x2c9   : > { %4445 = vmatprep.subr.msk.mxu0 %vm495_vm0, %v1598_v52 }
 0x2cb   : > { %v1595_v53 = vpop.permute.xlu1 %1594  ;;  %v1589_v54 = vpop.permute.xlu0 %1588 }
 0x2cc   : > { %v1599_v56 = vsel %vm1596_vm13, %v1593_v50, %v1595_v53  ;;  %v1597_v57 = vsel %vm1596_vm13, %v1589_v54, %v1591_v51  ;;  %4448 = vmatprep.subr.msk.mxu1 %vm495_vm0, %v1595_v53  ;;  %vm2127_vm13 = vcmask 359424  }
 0x2ce   : > { %4441 = vmatmul.mubr.msk.f32.vlgmr.msra.gmra.mrb[0].mxu0 %vm744_vm2, %v1407_v55  ;;  %4444 = vmatmul.mubr.msk.f32.vlgmr.msra.gmra.mrb[0].mxu1 %vm744_vm2, %v1407_v55 }
 0x2cf   : > { %4446 = vmatpush1.msk.msra.mxu0 %vm495_vm0, %v1597_v57  ;;  %4449 = vmatpush1.msk.msra.mxu1 %vm495_vm0, %v1599_v56  ;;  %v1770_v58 = vpop.permute.xlu1 %1769  ;;  %v1768_v60 = vpop.permute.xlu0 %1767 }
 0x2d0   : > { %v1775_v61 = vsel %vm1773_vm14, %v1768_v60, %v1770_v58  ;;  %1675 = vmatprep.mubr.f32.mxu0 %v5142_v9  ;;  %1746 = vmatprep.mubr.f32.mxu1 %v5142_v9 }
 0x2d1   : > { %4451 = vmatprep.subr.msk.mxu0 %vm495_vm0, %v1775_v61 }
 0x2d3   : > { %v1772_v63 = vpop.permute.xlu1 %1771  ;;  %v1766_v1 = vpop.permute.xlu0 %1765 }
 0x2d4   : > { %v1776_v3 = vsel %vm1773_vm14, %v1770_v58, %v1772_v63  ;;  %v1774_v4 = vsel %vm1773_vm14, %v1766_v1, %v1768_v60  ;;  %4454 = vmatprep.subr.msk.mxu1 %vm495_vm0, %v1772_v63  ;;  %vm2297_vm14 = vcmask 125952  }
 0x2d6   : > { %4447 = vmatmul.mubr.msk.f32.vlgmr.msra.gmra.mrb[0].mxu0 %vm744_vm2, %v1583_v2  ;;  %4450 = vmatmul.mubr.msk.f32.vlgmr.msra.gmra.mrb[0].mxu1 %vm744_vm2, %v1583_v2 }
 0x2d7   : > { %4452 = vmatpush1.msk.msra.mxu0 %vm495_vm0, %v1774_v4  ;;  %4455 = vmatpush1.msk.msra.mxu1 %vm495_vm0, %v1776_v3  ;;  %v1947_v5 = vpop.permute.xlu1 %1946  ;;  %v1945_v7 = vpop.permute.xlu0 %1944  ;;  %v5148_v3 = vmov 0  }
 0x2d8   : > { %v1952_v8 = vsel %vm1950_vm12, %v1945_v7, %v1947_v5  ;;  %1852 = vmatprep.mubr.f32.mxu0 %v5142_v9  ;;  %1923 = vmatprep.mubr.f32.mxu1 %v5142_v9 }
 0x2d9   : > { %4457 = vmatprep.subr.msk.mxu0 %vm495_vm0, %v1952_v8  ;;  %4763 = vset.pattern.permute.xlu0 %v5148_v3  ;;  %v2325_v8 = vld [vmem:[#allocation11] sm:$0xf] }
 0x2da   : > { %4764 = vset.pattern.permute.xlu1 %v5148_v3 }
 0x2db   : > { %v1949_v10 = vpop.permute.xlu1 %1948  ;;  %v1943_v11 = vpop.permute.xlu0 %1942 }
 0x2dc   : > { %v1953_v13 = vsel %vm1950_vm12, %v1947_v5, %v1949_v10  ;;  %v1951_v14 = vsel %vm1950_vm12, %v1943_v11, %v1945_v7  ;;  %4460 = vmatprep.subr.msk.mxu1 %vm495_vm0, %v1949_v10  ;;  %vm2370_vm12 = vcmask 343040  }
 0x2de   : > { %4453 = vmatmul.mubr.msk.f32.vlgmr.msra.gmra.mrb[0].mxu0 %vm744_vm2, %v1760_v12  ;;  %4456 = vmatmul.mubr.msk.f32.vlgmr.msra.gmra.mrb[0].mxu1 %vm744_vm2, %v1760_v12  ;;  %v2329_v12 = vld [vmem:[#allocation13] sm:$0xf] }
 0x2df   : > { %4458 = vmatpush1.msk.msra.mxu0 %vm495_vm0, %v1951_v14  ;;  %4461 = vmatpush1.msk.msra.mxu1 %vm495_vm0, %v1953_v13  ;;  %v2124_v15 = vpop.permute.xlu1 %2123  ;;  %v2122_v16 = vpop.permute.xlu0 %2121 }
 0x2e0   : > { %v2129_v17 = vsel %vm2127_vm13, %v2122_v16, %v2124_v15  ;;  %2029 = vmatprep.mubr.f32.mxu0 %v5142_v9  ;;  %2100 = vmatprep.mubr.f32.mxu1 %v5142_v9 }
 0x2e1   : > { %4463 = vmatprep.subr.msk.mxu0 %vm495_vm0, %v2129_v17 }
 0x2e3   : > { %v2126_v18 = vpop.permute.xlu1 %2125  ;;  %v2120_v19 = vpop.permute.xlu0 %2119 }
 0x2e4   : > { %v2130_v21 = vsel %vm2127_vm13, %v2124_v15, %v2126_v18  ;;  %v2128_v22 = vsel %vm2127_vm13, %v2120_v19, %v2122_v16  ;;  %4466 = vmatprep.subr.msk.mxu1 %vm495_vm0, %v2126_v18 }
 0x2e6   : > { %4459 = vmatmul.mubr.msk.f32.vlgmr.msra.gmra.mrb[0].mxu0 %vm744_vm2, %v1937_v20  ;;  %4462 = vmatmul.mubr.msk.f32.vlgmr.msra.gmra.mrb[0].mxu1 %vm744_vm2, %v1937_v20 }
 0x2e7   : > { %4464 = vmatpush1.msk.msra.mxu0 %vm495_vm0, %v2128_v22  ;;  %4467 = vmatpush1.msk.msra.mxu1 %vm495_vm0, %v2130_v21 }
 0x2e8   : > { %2206 = vmatprep.mubr.f32.mxu0 %v5142_v9  ;;  %2277 = vmatprep.mubr.f32.mxu1 %v5142_v9 }
 0x2ee   : > { %4465 = vmatmul.mubr.msk.f32.vlgmr.msra.gmra.mrb[0].mxu0 %vm744_vm2, %v2114_v23  ;;  %4468 = vmatmul.mubr.msk.f32.vlgmr.msra.gmra.mrb[0].mxu1 %vm744_vm2, %v2114_v23 }
 0x2ef   : > { %2721 = vmatprep.mubr.f32.mxu1 %v5142_v9  ;;  %2650 = vmatprep.mubr.f32.mxu0 %v5142_v9 }
 0x3c1   : > { %v2208_v24 = vpop.f32.mrb[0].mxu0  ;;  %v2279_v25 = vpop.f32.mrb[0].mxu1 }
 0x3c2   : > { %v2288_v26 = vmul.f32 %v2208_v24, %v5591_v36  ;;  %v2210_v27 = vpop.f32.mrb[1].mxu0  ;;  %v2281_v28 = vpop.f32.mrb[1].mxu1  ;;  %v2290_v29 = vmul.f32 %v2279_v25, %v5585_v33 }
 0x3c3   : > { %v2289_v30 = vmul.f32 %v2210_v27, %v5593_v37  ;;  %v2291_v35 = vmul.f32 %v2281_v28, %v5587_v34 }
 0x3c4   : > { %v2292_v31 = vsel %vm495_vm0, %v2288_v26, 0.0  ;;  %v2295_v39 = vsel %vm495_vm0, %v2290_v29, 0.0 }
 0x3c5   : > { %v2293_v32 = vsel %vm495_vm0, %v2289_v30, 0.0  ;;  %v2298_v41 = vsel %vm2297_vm14, %v2291_v35, 0.0 }
 0x3c6   : > { %v2294_v38 = vadd.f32 %v2293_v32, %v2292_v31 }
 0x3c8   : > { %v2296_v40 = vadd.f32 %v2295_v39, %v2294_v38 }
 0x3ca   : > { %v2299_v42 = vadd.f32 %v2298_v41, %v2296_v40 }
 0x3cc   : > { %2300 = vadd.xlane.f32.xlu0 %v2299_v42 }
 0x459   : > { %v2301_v43 = vpop.xlane.xlu0 %2300 }
 0x45a   : > { %v2302_v44 = vmul.f32 0.00390625, %v2301_v43 }
 0x45c   : > { %v2303_v45 = vsub.f32 %v2208_v24, %v2302_v44  ;;  %v2304_v46 = vsub.f32 %v2210_v27, %v2302_v44  ;;  %v2305_v47 = vsub.f32 %v2279_v25, %v2302_v44  ;;  %v2306_v48 = vsub.f32 %v2281_v28, %v2302_v44 }
 0x45e   : > { %v2307_v49 = vmul.f32 %v2303_v45, %v2303_v45  ;;  %v2308_v50 = vmul.f32 %v2304_v46, %v2304_v46  ;;  %v2309_v51 = vmul.f32 %v2305_v47, %v2305_v47  ;;  %v2310_v52 = vmul.f32 %v2306_v48, %v2306_v48 }
 0x45f   : > { %v2425_v46 = vstv %s5774_s12  ;;  %v2387_v47 = vstv %s4469_s21  ;;  %s4475_s12 = sld [smem:[#allocation14 + $0x7]]  ;;  %s6072_s21 = smov 87  }
 0x460   : > { %v2311_v53 = vmul.f32 %v2307_v49, %v5591_v36  ;;  %v2312_v54 = vmul.f32 %v2308_v50, %v5593_v37  ;;  %v2313_v55 = vmul.f32 %v2309_v51, %v5585_v33  ;;  %v2314_v56 = vmul.f32 %v2310_v52, %v5587_v34 }
 0x461   : > { %v2444_v51 = vstv %s5778_s20  ;;  %v2406_v52 = vstv %s4470_s22  ;;  %s4476_s22 = sld [smem:[#allocation14 + $0x8]]  ;;  %s5154_s20 = smov 65  }
 0x462   : > { %v2315_v57 = vsel %vm495_vm0, %v2311_v53, 0.0  ;;  %v2316_v58 = vsel %vm495_vm0, %v2312_v54, 0.0  ;;  %v2318_v61 = vsel %vm495_vm0, %v2313_v55, 0.0  ;;  %v2320_v1 = vsel %vm2297_vm14, %v2314_v56, 0.0 }
 0x463   : > { %v2317_v60 = vadd.f32 %v2316_v58, %v2315_v57 }
 0x465   : > { %v2319_v63 = vadd.f32 %v2318_v61, %v2317_v60  ;;  %v2482_v60 = vstv %s5791_s26  ;;  %s5153_s26 = smov 66  }
 0x467   : > { %v2321_v2 = vadd.f32 %v2320_v1, %v2319_v63  ;;  %v2501_v1 = vstv %s4475_s12  ;;  %s6075_s12 = sshll.u32 %s5513_s2, 4 }
 0x469   : > { %2322 = vadd.xlane.f32.xlu1 %v2321_v2 }
 0x4f6   : > { %v2323_v4 = vpop.xlane.xlu1 %2322 }
 0x4f7   : > { %v2324_v5 = vmul.f32 0.00390625, %v2323_v4  ;;  %v2520_v4 = vstv %s4476_s22  ;;  %s490_s22 = scalar_lea.vmem [#allocation21], %s6075_s12 }
 0x4f9   : > { %v2326_v7 = vadd.f32 1e-05, %v2324_v5 }
 0x4fb   : > { %4769 = vrsqrt.f32 %v2326_v7 }
 0x505   : > { %v4770_v10 = vpop.eup %4769 }
 0x506   : > { %v2328_v11 = vmul.f32 %v4770_v10, %v2325_v8 }
 0x508   : > { %2334 = vperm.xlu0 %4763, %v2328_v11   ;;  %v2330_v13 = vmul.f32 %v2328_v11, %v2302_v44 }
 0x50a   : > { %v2331_v14 = vsub.f32 %v2329_v12, %v2330_v13 }
 0x50c   : > { %2343 = vperm.xlu1 %4764, %v2331_v14  }
 0x587   : > { %v2335_v15 = vpop.permute.xlu0 %2334 }
 0x588   : > { %v2337_v16 = vmul.f32 %v2335_v15, %v2208_v24  ;;  %v2338_v17 = vmul.f32 %v2335_v15, %v2210_v27  ;;  %v2339_v18 = vmul.f32 %v2335_v15, %v2279_v25  ;;  %v2340_v19 = vmul.f32 %v2335_v15, %v2281_v28 }
 0x58b   : > { %v2344_v20 = vpop.permute.xlu1 %2343 }
 0x58c   : > { %v2346_v21 = vadd.f32 %v2344_v20, %v2337_v16  ;;  %v2347_v22 = vadd.f32 %v2344_v20, %v2338_v17  ;;  %v2348_v23 = vadd.f32 %v2344_v20, %v2339_v18  ;;  %v2349_v26 = vadd.f32 %v2344_v20, %v2340_v19 }
 0x58e   : > { %v2350_v29 = vmax.f32 %v2346_v21, 0.0  ;;  %v2351_v30 = vmax.f32 %v2347_v22, 0.0  ;;  %v2352_v31 = vmax.f32 %v2348_v23, 0.0  ;;  %v2353_v32 = vmax.f32 %v2349_v26, 0.0 }
 0x590   : > { %v2354_v35 = vmul.f32 %v2350_v29, %v5591_v36  ;;  %v2355_v38 = vmul.f32 %v2351_v30, %v5593_v37  ;;  %v2356_v39 = vmul.f32 %v2352_v31, %v5585_v33  ;;  %v2357_v24 = vmul.f32 %v2353_v32, %v5587_v34 }
 0x592   : > { %v2362_v27 = vcombine.low %v2354_v35, %v2355_v38  ;;  %v2363_v25 = vcombine.low %v2356_v39, %v2357_v24 }
 0x594   : > { %2364 = vrot.lane.b32.xlu1 %v2362_v27, %s5149_s25 }
 0x598   : > { %2366 = vrot.lane.b32.xlu1 %v2363_v25, %s5149_s25  ;;  %s5784_s25 = sld [smem:[#allocation14 + $0x5]] }
 0x59e   : > { %v2463_v55 = vstv %s5784_s25  ;;  %s4537_s25 = sshll.u32 %s5232_s19, 8  ;;  %s4207_s19 = scalar_lea.sflag [#allocation5], %s5513_s2 }
 0x606   : > { %v2365_v28 = vpop.permute.xlu1 %2364 }
 0x607   : > { %v2368_v40 = vrot.slane %v2365_v28, 4 }
 0x609   : > { %v2371_v41 = vsel %vm2370_vm12, %v2368_v40, %v2365_v28 }
 0x60a   : > { %2376 = vst.msk [vmem:[#allocation2] sm:$0xff] %vm5640_vm15, %v2371_v41  ;;  %v2367_v42 = vpop.permute.xlu1 %2366 }
 0x60b   : > { %v2369_v43 = vrot.slane %v2367_v42, 4 }
 0x60d   : > { %v2372_v44 = vsel %vm495_vm0, %v2368_v40, %v2369_v43 }
 0x60e   : > { %v2373_v45 = vsel %vm2370_vm12, %v2372_v44, %v2367_v42 }
 0x60f   : > { %2377 = vst.msk [vmem:[#allocation2 + $0x8] sm:$0xff] %vm5646_vm1, %v2373_v45 }
 0x611   : > { %v5786_v48 = vld [vmem:[#allocation2] sm:$0xff] }
 0x612   : > { %v2426_v49 = vmul.f32 %v2425_v46, %v5786_v48  ;;  %v2388_v50 = vmul.f32 %v2387_v47, %v5786_v48  ;;  %v2445_v53 = vmul.f32 %v2444_v51, %v5786_v48  ;;  %v2407_v54 = vmul.f32 %v2406_v52, %v5786_v48 }
 0x613   : > { %v2464_v57 = vmul.f32 %v2463_v55, %v5786_v48  ;;  %v2483_v61 = vmul.f32 %v2482_v60, %v5786_v48  ;;  %v2502_v2 = vmul.f32 %v2501_v1, %v5786_v48  ;;  %v2521_v5 = vmul.f32 %v2520_v4, %v5786_v48 }
 0x614   : > { %2430 = vrot.lane.b32.xlu0 %v2426_v49, %s5135_s17  ;;  %2392 = vrot.lane.b32.xlu1 %v2388_v50, %s5134_s24 }
 0x616   : > { %v2380_v56 = vld [vmem:[#allocation2 + $0x8] sm:$0xff] }
 0x617   : > { %v2389_v58 = vmul.f32 %v2387_v47, %v2380_v56  ;;  %v2408_v63 = vmul.f32 %v2406_v52, %v2380_v56  ;;  %v2427_v3 = vmul.f32 %v2425_v46, %v2380_v56  ;;  %v2446_v7 = vmul.f32 %v2444_v51, %v2380_v56 }
 0x618   : > { %2449 = vrot.lane.b32.xlu0 %v2445_v53, %s5136_s1  ;;  %2411 = vrot.lane.b32.xlu1 %v2407_v54, %s5133_s11  ;;  %v2465_v8 = vmul.f32 %v2463_v55, %v2380_v56  ;;  %v2484_v10 = vmul.f32 %v2482_v60, %v2380_v56  ;;  %v2503_v11 = vmul.f32 %v2501_v1, %v2380_v56 }
 0x619   : > { %v2522_v12 = vmul.f32 %v2520_v4, %v2380_v56 }
 0x61c   : > { %2468 = vrot.lane.b32.xlu0 %v2464_v57, %s5137_s29  ;;  %2394 = vrot.lane.b32.xlu1 %v2389_v58, %s5134_s24  ;;  %s6073_s24 = smov 86  }
 0x620   : > { %2487 = vrot.lane.b32.xlu0 %v2483_v61, %s5138_s28  ;;  %2413 = vrot.lane.b32.xlu1 %v2408_v63, %s5133_s11  ;;  %s2378_s11 = sld [smem:[#allocation14]] }
 0x624   : > { %2506 = vrot.lane.b32.xlu0 %v2502_v2, %s6072_s21  ;;  %2432 = vrot.lane.b32.xlu1 %v2427_v3, %s5135_s17  ;;  %s6074_s17 = smov 21  }
 0x626   : > { %v2381_v30 = vstv %s2378_s11 }
 0x627   : > { %v2382_v25 = vmul.f32 %v2381_v30, %v5786_v48  ;;  %v2383_v28 = vmul.f32 %v2381_v30, %v2380_v56 }
 0x628   : > { %2525 = vrot.lane.b32.xlu0 %v2521_v5, %s6073_s24  ;;  %2451 = vrot.lane.b32.xlu1 %v2446_v7, %s5136_s1 }
 0x62c   : > { %2470 = vrot.lane.b32.xlu1 %v2465_v8, %s5137_s29 }
 0x630   : > { %2489 = vrot.lane.b32.xlu1 %v2484_v10, %s5138_s28  ;;  %s5150_s28 = smov 105  }
 0x634   : > { %2508 = vrot.lane.b32.xlu1 %v2503_v11, %s6072_s21 }
 0x638   : > { %2527 = vrot.lane.b32.xlu1 %v2522_v12, %s6073_s24 }
 0x686   : > { %v2393_v13 = vpop.permute.xlu1 %2392  ;;  %v2431_v14 = vpop.permute.xlu0 %2430 }
 0x687   : > { %v2396_v22 = vrot.slane %v2393_v13, 4  ;;  %v2434_v38 = vrot.slane %v2431_v14, 4 }
 0x68a   : > { %v2412_v15 = vpop.permute.xlu1 %2411  ;;  %v2450_v17 = vpop.permute.xlu0 %2449 }
 0x68b   : > { %v2415_v29 = vrot.slane %v2412_v15, 4  ;;  %v2453_v42 = vrot.slane %v2450_v17, 4 }
 0x68e   : > { %v2395_v16 = vpop.permute.xlu1 %2394  ;;  %v2469_v19 = vpop.permute.xlu0 %2468 }
 0x68f   : > { %v2397_v21 = vrot.slane %v2395_v16, 4  ;;  %v2472_v49 = vrot.slane %v2469_v19, 4 }
 0x691   : > { %v2398_v31 = vsel %vm495_vm0, %v2396_v22, %v2397_v21  ;;  %v2400_v39 = vsel %vm520_vm4, %v2395_v16, %v2397_v21 }
 0x692   : > { %v2414_v18 = vpop.permute.xlu1 %2413  ;;  %v2488_v35 = vpop.permute.xlu0 %2487  ;;  %v2399_v40 = vsel %vm520_vm4, %v2393_v13, %v2398_v31  ;;  %v2404_v46 = vadd.f32 %v2400_v39, %v2383_v28  ;;  %vm3437_vm4 = vcmask 695296  }
 0x693   : > { %v2416_v23 = vrot.slane %v2414_v18, 4  ;;  %v2403_v50 = vadd.f32 %v2399_v40, %v2382_v25  ;;  %v2491_v48 = vrot.slane %v2488_v35, 4 }
 0x695   : > { %v2417_v24 = vsel %vm495_vm0, %v2415_v29, %v2416_v23  ;;  %v2419_v43 = vsel %vm540_vm3, %v2414_v18, %v2416_v23 }
 0x696   : > { %v2433_v20 = vpop.permute.xlu1 %2432  ;;  %v2418_v47 = vsel %vm540_vm3, %v2412_v15, %v2417_v24  ;;  %v2423_v53 = vadd.f32 %v2419_v43, %v2404_v46  ;;  %v2507_v54 = vpop.permute.xlu0 %2506  ;;  %vm2908_vm3 = vcmask 859136  }
 0x697   : > { %v2435_v32 = vrot.slane %v2433_v20, 4  ;;  %v2422_v57 = vadd.f32 %v2418_v47, %v2403_v50  ;;  %v2510_v10 = vrot.slane %v2507_v54, 4 }
 0x699   : > { %v2436_v44 = vsel %vm495_vm0, %v2434_v38, %v2435_v32  ;;  %v2438_v51 = vsel %vm560_vm5, %v2433_v20, %v2435_v32 }
 0x69a   : > { %v2452_v26 = vpop.permute.xlu1 %2451  ;;  %v2437_v55 = vsel %vm560_vm5, %v2431_v14, %v2436_v44  ;;  %v2442_v63 = vadd.f32 %v2438_v51, %v2423_v53  ;;  %v2526_v14 = vpop.permute.xlu0 %2525  ;;  %v2559_v51 = vld [vmem:[#allocation16 + $0x4] sm:$0xf]  ;;  %vm3614_vm5 = vcmask 547840  }
 0x69b   : > { %v2454_v27 = vrot.slane %v2452_v26, 4  ;;  %v2441_v2 = vadd.f32 %v2437_v55, %v2422_v57 }
 0x69d   : > { %v2455_v52 = vsel %vm495_vm0, %v2453_v42, %v2454_v27  ;;  %v2457_v58 = vsel %vm580_vm6, %v2452_v26, %v2454_v27 }
 0x69e   : > { %v2471_v41 = vpop.permute.xlu1 %2470  ;;  %v2456_v1 = vsel %vm580_vm6, %v2450_v17, %v2455_v52  ;;  %v2461_v5 = vadd.f32 %v2457_v58, %v2442_v63  ;;  %v2557_v58 = vld [vmem:[#allocation16] sm:$0xf] }
 0x69f   : > { %v2473_v45 = vrot.slane %v2471_v41, 4  ;;  %v2460_v11 = vadd.f32 %v2456_v1, %v2441_v2 }
 0x6a1   : > { %v2474_v60 = vsel %vm495_vm0, %v2472_v49, %v2473_v45  ;;  %v2476_v3 = vsel %vm600_vm7, %v2471_v41, %v2473_v45 }
 0x6a2   : > { %v2490_v56 = vpop.permute.xlu1 %2489  ;;  %v2475_v7 = vsel %vm600_vm7, %v2469_v19, %v2474_v60  ;;  %v2480_v15 = vadd.f32 %v2476_v3, %v2461_v5  ;;  %v2529_v19 = vrot.slane %v2526_v14, 4  ;;  %v2895_v5 = vld [vmem:[#allocation16 + $0x8] sm:$0xf] }
 0x6a3   : > { %v2492_v61 = vrot.slane %v2490_v56, 4  ;;  %v2479_v18 = vadd.f32 %v2475_v7, %v2460_v11 }
 0x6a5   : > { %v2493_v4 = vsel %vm495_vm0, %v2491_v48, %v2492_v61  ;;  %v2495_v12 = vsel %vm620_vm8, %v2490_v56, %v2492_v61 }
 0x6a6   : > { %v2509_v8 = vpop.permute.xlu1 %2508  ;;  %v2494_v16 = vsel %vm620_vm8, %v2488_v35, %v2493_v4  ;;  %v2499_v21 = vadd.f32 %v2495_v12, %v2480_v15  ;;  %v3072_v15 = vld [vmem:[#allocation16 + $0xc] sm:$0xf]  ;;  %vm4203_vm8 = vcmask 130052  }
 0x6a7   : > { %v2511_v13 = vrot.slane %v2509_v8, 4  ;;  %v2498_v26 = vadd.f32 %v2494_v16, %v2479_v18 }
 0x6a9   : > { %v2512_v17 = vsel %vm495_vm0, %v2510_v10, %v2511_v13  ;;  %v2514_v20 = vsel %vm640_vm9, %v2509_v8, %v2511_v13 }
 0x6aa   : > { %v2513_v22 = vsel %vm640_vm9, %v2507_v54, %v2512_v17  ;;  %v2528_v23 = vpop.permute.xlu1 %2527  ;;  %v2518_v30 = vadd.f32 %v2514_v20, %v2499_v21 }
 0x6ab   : > { %v2530_v29 = vrot.slane %v2528_v23, 4  ;;  %v2517_v38 = vadd.f32 %v2513_v22, %v2498_v26 }
 0x6ad   : > { %v2531_v31 = vsel %vm495_vm0, %v2529_v19, %v2530_v29  ;;  %v2533_v32 = vsel %vm660_vm10, %v2528_v23, %v2530_v29  ;;  %v3248_v19 = vld [vmem:[#allocation16 + $0x10] sm:$0xf] }
 0x6ae   : > { %v2537_v39 = vadd.f32 %v2533_v32, %v2518_v30  ;;  %v2532_v35 = vsel %vm660_vm10, %v2526_v14, %v2531_v31 }
 0x6af   : > { %v2536_v24 = vadd.f32 %v2532_v35, %v2517_v38  ;;  %v3424_v35 = vld [vmem:[#allocation16 + $0x14] sm:$0xf] }
 0x6b0   : > { %v2539_v27 = vmul.f32 %v2537_v39, %v5635_v62 }
 0x6b1   : > { %v2538_v25 = vmul.f32 %v2536_v24, %v5630_v59 }
 0x6b2   : > { %2544 = vrot.lane.b32.xlu1 %v2539_v27, %s6074_s17 }
 0x6b3   : > { %2542 = vrot.lane.b32.xlu0 %v2538_v25, %s6074_s17  ;;  %s5974_s17 = scalar_lea.hbm %s6028_s10, %s4537_s25 }
 0x724   : > { %v2545_v28 = vpop.permute.xlu1 %2544 }
 0x725   : > { %v2547_v40 = vrot.slane %v2545_v28, 4  ;;  %v2543_v41 = vpop.permute.xlu0 %2542 }
 0x726   : > { %v2546_v42 = vrot.slane %v2543_v41, 4 }
 0x728   : > { %v2548_v43 = vsel %vm696_vm11, %v2546_v42, %v2543_v41  ;;  %v2549_v44 = vsel %vm495_vm0, %v2546_v42, %v2547_v40 }
 0x729   : > { %v2550_v45 = vsel %vm696_vm11, %v2549_v44, %v2545_v28  ;;  %2553 = vst.msk [vmem:[#allocation2] sm:$0xff] %vm5640_vm15, %v2548_v43  ;;  %v3601_v43 = vld [vmem:[#allocation16 + $0x18] sm:$0xf] }
 0x72a   : > { %2554 = vst.msk [vmem:[#allocation2 + $0x8] sm:$0xff] %vm5646_vm1, %v2550_v45 }
 0x730   : > { %v2555_v59 = vld [vmem:[#allocation2] sm:$0xff] }
 0x731   : > { %v2556_v62 = vld [vmem:[#allocation2 + $0x8] sm:$0xff]  ;;  %v2562_v46 = vcombine.high %v2555_v59, %v2555_v59 }
 0x732   : > { %2568 = vrot.lane.b32.xlu1 %v2556_v62, %s5137_s29  ;;  %v2563_v47 = vcombine.high %v2556_v62, %v2556_v62 }
 0x733   : > { %2566 = vrot.lane.b32.xlu0 %v2562_v46, %s5137_s29 }
 0x736   : > { %2570 = vrot.lane.b32.xlu1 %v2563_v47, %s5137_s29 }
 0x737   : > { %2564 = vrot.lane.b32.xlu0 %v2555_v59, %s5137_s29  ;;  %s5152_s29 = smov 67  }
 0x73a   : > { %2732 = vrot.lane.b32.xlu1 %v2556_v62, %s5136_s1 }
 0x73b   : > { %2730 = vrot.lane.b32.xlu0 %v2562_v46, %s5136_s1 }
 0x73e   : > { %2734 = vrot.lane.b32.xlu1 %v2563_v47, %s5136_s1 }
 0x73f   : > { %2728 = vrot.lane.b32.xlu0 %v2555_v59, %s5136_s1  ;;  %s5151_s1 = smov 85  }
 0x742   : > { %2904 = vrot.lane.b32.xlu1 %v2556_v62, %s5150_s28 }
 0x743   : > { %2902 = vrot.lane.b32.xlu0 %v2562_v46, %s5150_s28 }
 0x746   : > { %2906 = vrot.lane.b32.xlu1 %v2563_v47, %s5150_s28 }
 0x747   : > { %2900 = vrot.lane.b32.xlu0 %v2555_v59, %s5150_s28 }
 0x74a   : > { %3081 = vrot.lane.b32.xlu1 %v2556_v62, %s6072_s21 }
 0x74b   : > { %3079 = vrot.lane.b32.xlu0 %v2562_v46, %s6072_s21 }
 0x74e   : > { %3083 = vrot.lane.b32.xlu1 %v2563_v47, %s6072_s21 }
 0x74f   : > { %3077 = vrot.lane.b32.xlu0 %v2555_v59, %s6072_s21  ;;  %s4221_s21 = sshll.u32 %s490_s22, 4  ;;  %s5976_s21 = int_to_ptr.vmem [resolvable:$true] %s4221_s21 }
 0x750   : > { %s5025_s28 = scalar_lea.vmem %s5976_s21, 256 }
 0x751   : > { %p5026_p6 = scmp.ne.s32.totalorder %s5976_s21, %s5025_s28 }
 0x752   : > { %3257 = vrot.lane.b32.xlu1 %v2556_v62, %s6073_s24 }
 0x753   : > { %3255 = vrot.lane.b32.xlu0 %v2562_v46, %s6073_s24  ;;  %p5027_p13 = pnand %p5026_p6, %p6076_p12 }
 0x755   : > { %p5028_p8 = pneg %p5027_p13 }
 0x756   : > { %3259 = vrot.lane.b32.xlu1 %v2563_v47, %s6073_s24 }
 0x757   : > { %3253 = vrot.lane.b32.xlu0 %v2555_v59, %s6073_s24 }
 0x75a   : > { %3433 = vrot.lane.b32.xlu1 %v2556_v62, %s5151_s1 }
 0x75b   : > { %3431 = vrot.lane.b32.xlu0 %v2562_v46, %s5151_s1 }
 0x75e   : > { %3435 = vrot.lane.b32.xlu1 %v2563_v47, %s5151_s1 }
 0x75f   : > { %3429 = vrot.lane.b32.xlu0 %v2555_v59, %s5151_s1  ;;  %s5155_s1 = smov [#allocation21]  }
 0x762   : > { %3610 = vrot.lane.b32.xlu1 %v2556_v62, %s5152_s29 }
 0x763   : > { %3608 = vrot.lane.b32.xlu0 %v2562_v46, %s5152_s29 }
 0x766   : > { %3612 = vrot.lane.b32.xlu1 %v2563_v47, %s5152_s29 }
 0x767   : > { %3606 = vrot.lane.b32.xlu0 %v2555_v59, %s5152_s29  ;;  %s5029_s29 = sshll.u32 %s5155_s1, 4  ;;  %s5030_s29 = int_to_ptr.vmem [resolvable:$false] %s5029_s29 }
 0x768   : > { %p5032_p1 = scmp.lt.s32.totalorder %s5976_s21, %s5030_s29 }
 0x76a   : > { %3787 = vrot.lane.b32.xlu1 %v2556_v62, %s5153_s26 }
 0x76b   : > { %3785 = vrot.lane.b32.xlu0 %v2562_v46, %s5153_s26 }
 0x76e   : > { %3789 = vrot.lane.b32.xlu1 %v2563_v47, %s5153_s26 }
 0x76f   : > { %3783 = vrot.lane.b32.xlu0 %v2555_v59, %s5153_s26  ;;  %s5031_s26 = scalar_lea.vmem %s5030_s29, 512 }
 0x770   : > { %p5033_p10 = scmp.lt.s32.totalorder %s5031_s26, %s5025_s28 }
 0x772   : > { %3964 = vrot.lane.b32.xlu1 %v2556_v62, %s5154_s20  ;;  %p5034_p3 = por %p5033_p10, %p5032_p1 }
 0x773   : > { %3962 = vrot.lane.b32.xlu0 %v2562_v46, %s5154_s20 }
 0x774   : > { %p5035_p11 = pnand %p5034_p3, %p5028_p8 }
 0x776   : > { %3966 = vrot.lane.b32.xlu1 %v2563_v47, %s5154_s20 }
 0x777   : > { %3960 = vrot.lane.b32.xlu0 %v2555_v59, %s5154_s20 }
 0x7a4   : > { %v2569_v0 = vpop.permute.xlu1 %2568 }
 0x7a5   : > { %v2567_v6 = vpop.permute.xlu0 %2566 }
 0x7a6   : > { %v2573_v49 = vsel %vm600_vm7, %v2567_v6, %v2569_v0 }
 0x7a7   : > { %4477 = vmatprep.subr.msk.mxu0 %vm495_vm0, %v2573_v49 }
 0x7a8   : > { %v2571_v50 = vpop.permute.xlu1 %2570 }
 0x7a9   : > { %v2574_v52 = vsel %vm600_vm7, %v2569_v0, %v2571_v50  ;;  %4480 = vmatprep.subr.msk.mxu1 %vm495_vm0, %v2571_v50  ;;  %v2565_v48 = vpop.permute.xlu0 %2564 }
 0x7aa   : > { %v2572_v53 = vsel %vm600_vm7, %v2565_v48, %v2567_v6  ;;  %4481 = vmatpush1.msk.msra.mxu1 %vm495_vm0, %v2574_v52  ;;  %v3778_v6 = vld [vmem:[#allocation16 + $0x1c] sm:$0xf]  ;;  %vm3968_vm7 = vcmask 531456  }
 0x7ab   : > { %4478 = vmatpush1.msk.msra.mxu0 %vm495_vm0, %v2572_v53  ;;  %4482 = vmatmul.mubr.msk.f32.vlgmr.msra.gmra.mrb[2].mxu1 %vm744_vm2, %v2559_v51 }
 0x7ac   : > { %v2733_v54 = vpop.permute.xlu1 %2732  ;;  %4479 = vmatmul.mubr.msk.f32.vlgmr.msra.gmra.mrb[2].mxu0 %vm744_vm2, %v2559_v51  ;;  %2885 = vmatprep.mubr.f32.mxu1 %v5142_v9 }
 0x7ad   : > { %v2731_v55 = vpop.permute.xlu0 %2730  ;;  %2814 = vmatprep.mubr.f32.mxu0 %v5142_v9 }
 0x7ae   : > { %v2737_v56 = vsel %vm580_vm6, %v2731_v55, %v2733_v54 }
 0x7af   : > { %4483 = vmatprep.subr.msk.mxu0 %vm495_vm0, %v2737_v56 }
 0x7b0   : > { %v2735_v57 = vpop.permute.xlu1 %2734 }
 0x7b1   : > { %v2738_v60 = vsel %vm580_vm6, %v2733_v54, %v2735_v57  ;;  %4486 = vmatprep.subr.msk.mxu1 %vm495_vm0, %v2735_v57  ;;  %v2729_v61 = vpop.permute.xlu0 %2728 }
 0x7b2   : > { %v2736_v63 = vsel %vm580_vm6, %v2729_v61, %v2731_v55  ;;  %4487 = vmatpush1.msk.msra.mxu1 %vm495_vm0, %v2738_v60  ;;  %vm3791_vm6 = vcmask 539648   ;;  %v3955_v55 = vld [vmem:[#allocation16 + $0x20] sm:$0xf] }
 0x7b3   : > { %4484 = vmatpush1.msk.msra.mxu0 %vm495_vm0, %v2736_v63  ;;  %4488 = vmatmul.mubr.msk.f32.vlgmr.msra.gmra.mrb[2].mxu1 %vm744_vm2, %v2557_v58 }
 0x7b4   : > { %v2905_v1 = vpop.permute.xlu1 %2904  ;;  %4485 = vmatmul.mubr.msk.f32.vlgmr.msra.gmra.mrb[2].mxu0 %vm744_vm2, %v2557_v58  ;;  %3058 = vmatprep.mubr.f32.mxu1 %v5142_v9 }
 0x7b5   : > { %v2903_v2 = vpop.permute.xlu0 %2902  ;;  %2987 = vmatprep.mubr.f32.mxu0 %v5142_v9 }
 0x7b6   : > { %v2910_v3 = vsel %vm2908_vm3, %v2903_v2, %v2905_v1 }
 0x7b7   : > { %4489 = vmatprep.subr.msk.mxu0 %vm495_vm0, %v2910_v3 }
 0x7b8   : > { %v2907_v4 = vpop.permute.xlu1 %2906 }
 0x7b9   : > { %v2911_v7 = vsel %vm2908_vm3, %v2905_v1, %v2907_v4  ;;  %4492 = vmatprep.subr.msk.mxu1 %vm495_vm0, %v2907_v4  ;;  %v2901_v8 = vpop.permute.xlu0 %2900 }
 0x7ba   : > { %v2909_v10 = vsel %vm2908_vm3, %v2901_v8, %v2903_v2  ;;  %4493 = vmatpush1.msk.msra.mxu1 %vm495_vm0, %v2911_v7 }
 0x7bb   : > { %4490 = vmatpush1.msk.msra.mxu0 %vm495_vm0, %v2909_v10  ;;  %4494 = vmatmul.mubr.msk.f32.vlgmr.msra.gmra.mrb[2].mxu1 %vm744_vm2, %v2895_v5 }
 0x7bc   : > { %v3082_v11 = vpop.permute.xlu1 %3081  ;;  %4491 = vmatmul.mubr.msk.f32.vlgmr.msra.gmra.mrb[2].mxu0 %vm744_vm2, %v2895_v5  ;;  %3234 = vmatprep.mubr.f32.mxu1 %v5142_v9 }
 0x7bd   : > { %v3080_v12 = vpop.permute.xlu0 %3079  ;;  %3163 = vmatprep.mubr.f32.mxu0 %v5142_v9 }
 0x7be   : > { %v3086_v13 = vsel %vm640_vm9, %v3080_v12, %v3082_v11 }
 0x7bf   : > { %4495 = vmatprep.subr.msk.mxu0 %vm495_vm0, %v3086_v13 }
 0x7c0   : > { %v3084_v14 = vpop.permute.xlu1 %3083 }
 0x7c1   : > { %v3087_v16 = vsel %vm640_vm9, %v3082_v11, %v3084_v14  ;;  %4498 = vmatprep.subr.msk.mxu1 %vm495_vm0, %v3084_v14  ;;  %v3078_v18 = vpop.permute.xlu0 %3077 }
 0x7c2   : > { %v3085_v17 = vsel %vm640_vm9, %v3078_v18, %v3080_v12  ;;  %4499 = vmatpush1.msk.msra.mxu1 %vm495_vm0, %v3087_v16  ;;  %vm4204_vm9 = vmor %vm4203_vm8, %vm495_vm0 }
 0x7c3   : > { %4496 = vmatpush1.msk.msra.mxu0 %vm495_vm0, %v3085_v17  ;;  %4500 = vmatmul.mubr.msk.f32.vlgmr.msra.gmra.mrb[2].mxu1 %vm744_vm2, %v3072_v15 }
 0x7c4   : > { %v3258_v20 = vpop.permute.xlu1 %3257  ;;  %4497 = vmatmul.mubr.msk.f32.vlgmr.msra.gmra.mrb[2].mxu0 %vm744_vm2, %v3072_v15  ;;  %3410 = vmatprep.mubr.f32.mxu1 %v5142_v9 }
 0x7c5   : > { %v3256_v21 = vpop.permute.xlu0 %3255  ;;  %3339 = vmatprep.mubr.f32.mxu0 %v5142_v9 }
 0x7c6   : > { %v3262_v22 = vsel %vm660_vm10, %v3256_v21, %v3258_v20 }
 0x7c7   : > { %4501 = vmatprep.subr.msk.mxu0 %vm495_vm0, %v3262_v22 }
 0x7c8   : > { %v3260_v23 = vpop.permute.xlu1 %3259 }
 0x7c9   : > { %v3263_v26 = vsel %vm660_vm10, %v3258_v20, %v3260_v23  ;;  %4504 = vmatprep.subr.msk.mxu1 %vm495_vm0, %v3260_v23  ;;  %v3254_v29 = vpop.permute.xlu0 %3253 }
 0x7ca   : > { %v3261_v30 = vsel %vm660_vm10, %v3254_v29, %v3256_v21  ;;  %4505 = vmatpush1.msk.msra.mxu1 %vm495_vm0, %v3263_v26 }
 0x7cb   : > { %4502 = vmatpush1.msk.msra.mxu0 %vm495_vm0, %v3261_v30  ;;  %4506 = vmatmul.mubr.msk.f32.vlgmr.msra.gmra.mrb[2].mxu1 %vm744_vm2, %v3248_v19 }
 0x7cc   : > { %v3434_v31 = vpop.permute.xlu1 %3433  ;;  %4503 = vmatmul.mubr.msk.f32.vlgmr.msra.gmra.mrb[2].mxu0 %vm744_vm2, %v3248_v19  ;;  %3587 = vmatprep.mubr.f32.mxu1 %v5142_v9 }
 0x7cd   : > { %v3432_v32 = vpop.permute.xlu0 %3431  ;;  %3516 = vmatprep.mubr.f32.mxu0 %v5142_v9 }
 0x7ce   : > { %v3439_v38 = vsel %vm3437_vm4, %v3432_v32, %v3434_v31 }
 0x7cf   : > { %4507 = vmatprep.subr.msk.mxu0 %vm495_vm0, %v3439_v38 }
 0x7d0   : > { %v3436_v39 = vpop.permute.xlu1 %3435 }
 0x7d1   : > { %v3440_v24 = vsel %vm3437_vm4, %v3434_v31, %v3436_v39  ;;  %4510 = vmatprep.subr.msk.mxu1 %vm495_vm0, %v3436_v39  ;;  %v3430_v27 = vpop.permute.xlu0 %3429 }
 0x7d2   : > { %v3438_v25 = vsel %vm3437_vm4, %v3430_v27, %v3432_v32  ;;  %4511 = vmatpush1.msk.msra.mxu1 %vm495_vm0, %v3440_v24 }
 0x7d3   : > { %4508 = vmatpush1.msk.msra.mxu0 %vm495_vm0, %v3438_v25  ;;  %4512 = vmatmul.mubr.msk.f32.vlgmr.msra.gmra.mrb[2].mxu1 %vm744_vm2, %v3424_v35 }
 0x7d4   : > { %v3611_v28 = vpop.permute.xlu1 %3610  ;;  %4509 = vmatmul.mubr.msk.f32.vlgmr.msra.gmra.mrb[2].mxu0 %vm744_vm2, %v3424_v35  ;;  %3764 = vmatprep.mubr.f32.mxu1 %v5142_v9 }
 0x7d5   : > { %v3609_v40 = vpop.permute.xlu0 %3608  ;;  %3693 = vmatprep.mubr.f32.mxu0 %v5142_v9 }
 0x7d6   : > { %v3616_v41 = vsel %vm3614_vm5, %v3609_v40, %v3611_v28 }
 0x7d7   : > { %4513 = vmatprep.subr.msk.mxu0 %vm495_vm0, %v3616_v41 }
 0x7d8   : > { %v3613_v42 = vpop.permute.xlu1 %3612 }
 0x7d9   : > { %v3617_v44 = vsel %vm3614_vm5, %v3611_v28, %v3613_v42  ;;  %4516 = vmatprep.subr.msk.mxu1 %vm495_vm0, %v3613_v42  ;;  %v3607_v45 = vpop.permute.xlu0 %3606 }
 0x7da   : > { %v3615_v59 = vsel %vm3614_vm5, %v3607_v45, %v3609_v40  ;;  %4517 = vmatpush1.msk.msra.mxu1 %vm495_vm0, %v3617_v44 }
 0x7db   : > { %4514 = vmatpush1.msk.msra.mxu0 %vm495_vm0, %v3615_v59  ;;  %4518 = vmatmul.mubr.msk.f32.vlgmr.msra.gmra.mrb[2].mxu1 %vm744_vm2, %v3601_v43 }
 0x7dc   : > { %v3788_v62 = vpop.permute.xlu1 %3787  ;;  %4515 = vmatmul.mubr.msk.f32.vlgmr.msra.gmra.mrb[2].mxu0 %vm744_vm2, %v3601_v43  ;;  %3941 = vmatprep.mubr.f32.mxu1 %v5142_v9 }
 0x7dd   : > { %v3786_v46 = vpop.permute.xlu0 %3785  ;;  %3870 = vmatprep.mubr.f32.mxu0 %v5142_v9 }
 0x7de   : > { %v3793_v47 = vsel %vm3791_vm6, %v3786_v46, %v3788_v62 }
 0x7df   : > { %4519 = vmatprep.subr.msk.mxu0 %vm495_vm0, %v3793_v47 }
 0x7e0   : > { %v3790_v0 = vpop.permute.xlu1 %3789 }
 0x7e1   : > { %v3794_v49 = vsel %vm3791_vm6, %v3788_v62, %v3790_v0  ;;  %4522 = vmatprep.subr.msk.mxu1 %vm495_vm0, %v3790_v0  ;;  %v3784_v50 = vpop.permute.xlu0 %3783 }
 0x7e2   : > { %v3792_v51 = vsel %vm3791_vm6, %v3784_v50, %v3786_v46  ;;  %4523 = vmatpush1.msk.msra.mxu1 %vm495_vm0, %v3794_v49 }
 0x7e3   : > { %4520 = vmatpush1.msk.msra.mxu0 %vm495_vm0, %v3792_v51  ;;  %4524 = vmatmul.mubr.msk.f32.vlgmr.msra.gmra.mrb[2].mxu1 %vm744_vm2, %v3778_v6 }
 0x7e4   : > { %v3965_v52 = vpop.permute.xlu1 %3964  ;;  %4521 = vmatmul.mubr.msk.f32.vlgmr.msra.gmra.mrb[2].mxu0 %vm744_vm2, %v3778_v6  ;;  %4118 = vmatprep.mubr.f32.mxu1 %v5142_v9 }
 0x7e5   : > { %v3963_v48 = vpop.permute.xlu0 %3962  ;;  %4047 = vmatprep.mubr.f32.mxu0 %v5142_v9 }
 0x7e6   : > { %v3970_v53 = vsel %vm3968_vm7, %v3963_v48, %v3965_v52 }
 0x7e7   : > { %4525 = vmatprep.subr.msk.mxu0 %vm495_vm0, %v3970_v53 }
 0x7e8   : > { %v3967_v54 = vpop.permute.xlu1 %3966 }
 0x7e9   : > { %v3971_v56 = vsel %vm3968_vm7, %v3965_v52, %v3967_v54  ;;  %4528 = vmatprep.subr.msk.mxu1 %vm495_vm0, %v3967_v54  ;;  %v3961_v57 = vpop.permute.xlu0 %3960 }
 0x7ea   : > { %v3969_v58 = vsel %vm3968_vm7, %v3961_v57, %v3963_v48  ;;  %4529 = vmatpush1.msk.msra.mxu1 %vm495_vm0, %v3971_v56 }
 0x7eb   : > { %4526 = vmatpush1.msk.msra.mxu0 %vm495_vm0, %v3969_v58  ;;  %4530 = vmatmul.mubr.msk.f32.vlgmr.msra.gmra.mrb[2].mxu1 %vm744_vm2, %v3955_v55 }
 0x7ec   : > { %4527 = vmatmul.mubr.msk.f32.vlgmr.msra.gmra.mrb[2].mxu0 %vm744_vm2, %v3955_v55 }
 0x8be   : > { %v4120_v60 = vpop.f32.mrb[2].mxu1 }
 0x8bf   : > { %v4049_v9 = vpop.f32.mrb[2].mxu0  ;;  %v4122_v61 = vpop.f32.mrb[3].mxu1  ;;  %v4131_v2 = vmul.f32 %v4120_v60, %v5585_v33 }
 0x8c0   : > { %v4129_v63 = vmul.f32 %v4049_v9, %v5591_v36  ;;  %v4051_v1 = vpop.f32.mrb[3].mxu0  ;;  %v4132_v5 = vmul.f32 %v4122_v61, %v5587_v34 }
 0x8c1   : > { %v4130_v3 = vmul.f32 %v4051_v1, %v5593_v37  ;;  %v4136_v10 = vsel %vm495_vm0, %v4131_v2, 0.0 }
 0x8c2   : > { %v4133_v4 = vsel %vm495_vm0, %v4129_v63, 0.0  ;;  %v4138_v12 = vsel %vm2297_vm14, %v4132_v5, 0.0 }
 0x8c3   : > { %v4134_v7 = vsel %vm495_vm0, %v4130_v3, 0.0 }
 0x8c4   : > { %v4135_v8 = vadd.f32 %v4134_v7, %v4133_v4 }
 0x8c6   : > { %v4137_v11 = vadd.f32 %v4136_v10, %v4135_v8 }
 0x8c8   : > { %v4139_v13 = vadd.f32 %v4138_v12, %v4137_v11 }
 0x8ca   : > { %4140 = vadd.xlane.f32.xlu0 %v4139_v13 }
 0x957   : > { %v4141_v14 = vpop.xlane.xlu0 %4140 }
 0x958   : > { %v4142_v15 = vmul.f32 0.00390625, %v4141_v14 }
 0x95a   : > { %v4143_v16 = vsub.f32 %v4049_v9, %v4142_v15  ;;  %v4144_v18 = vsub.f32 %v4051_v1, %v4142_v15  ;;  %v4145_v17 = vsub.f32 %v4120_v60, %v4142_v15  ;;  %v4146_v20 = vsub.f32 %v4122_v61, %v4142_v15 }
 0x95c   : > { %v4147_v21 = vmul.f32 %v4143_v16, %v4143_v16  ;;  %v4148_v22 = vmul.f32 %v4144_v18, %v4144_v18  ;;  %v4149_v23 = vmul.f32 %v4145_v17, %v4145_v17  ;;  %v4150_v19 = vmul.f32 %v4146_v20, %v4146_v20 }
 0x95e   : > { %v4151_v26 = vmul.f32 %v4147_v21, %v5591_v36  ;;  %v4152_v29 = vmul.f32 %v4148_v22, %v5593_v37  ;;  %v4153_v30 = vmul.f32 %v4149_v23, %v5585_v33  ;;  %v4154_v31 = vmul.f32 %v4150_v19, %v5587_v34  ;;  %v4165_v37 = vld [vmem:[#allocation18] sm:$0xf]  ;;  %v4169_v34 = vld [vmem:[#allocation19] sm:$0xf] }
 0x960   : > { %v4155_v32 = vsel %vm495_vm0, %v4151_v26, 0.0  ;;  %v4156_v38 = vsel %vm495_vm0, %v4152_v29, 0.0  ;;  %v4158_v35 = vsel %vm495_vm0, %v4153_v30, 0.0  ;;  %v4160_v27 = vsel %vm2297_vm14, %v4154_v31, 0.0 }
 0x961   : > { %v4157_v39 = vadd.f32 %v4156_v38, %v4155_v32 }
 0x963   : > { %v4159_v24 = vadd.f32 %v4158_v35, %v4157_v39 }
 0x965   : > { %v4161_v25 = vadd.f32 %v4160_v27, %v4159_v24 }
 0x967   : > { %4162 = vadd.xlane.f32.xlu1 %v4161_v25 }
 0x9f4   : > { %v4163_v28 = vpop.xlane.xlu1 %4162 }
 0x9f5   : > { %v4164_v36 = vmul.f32 0.00390625, %v4163_v28 }
 0x9f7   : > { %v4166_v40 = vadd.f32 1e-05, %v4164_v36 }
 0x9f9   : > { %4771 = vrsqrt.f32 %v4166_v40 }
 0xa03   : > { %v4772_v33 = vpop.eup %4771 }
 0xa04   : > { %v4168_v41 = vmul.f32 %v4772_v33, %v4165_v37 }
 0xa06   : > { %4174 = vperm.xlu0 %4763, %v4168_v41   ;;  %v4170_v42 = vmul.f32 %v4168_v41, %v4142_v15 }
 0xa08   : > { %v4171_v43 = vsub.f32 %v4169_v34, %v4170_v42 }
 0xa0a   : > { %4183 = vperm.xlu1 %4764, %v4171_v43  }
 0xa85   : > { %v4175_v44 = vpop.permute.xlu0 %4174 }
 0xa86   : > { %v4177_v45 = vmul.f32 %v4175_v44, %v4049_v9  ;;  %v4178_v59 = vmul.f32 %v4175_v44, %v4051_v1  ;;  %v4179_v62 = vmul.f32 %v4175_v44, %v4120_v60  ;;  %v4180_v46 = vmul.f32 %v4175_v44, %v4122_v61 }
 0xa89   : > { %v4184_v47 = vpop.permute.xlu1 %4183 }
 0xa8a   : > { %v4186_v0 = vadd.f32 %v4184_v47, %v4177_v45  ;;  %v4187_v6 = vadd.f32 %v4184_v47, %v4178_v59  ;;  %v4188_v49 = vadd.f32 %v4184_v47, %v4179_v62  ;;  %v4189_v50 = vadd.f32 %v4184_v47, %v4180_v46 }
 0xa8c   : > { %v4190_v51 = vmax.f32 %v4186_v0, 0.0  ;;  %v4191_v52 = vmax.f32 %v4187_v6, 0.0  ;;  %v4192_v48 = vmax.f32 %v4188_v49, 0.0  ;;  %v4193_v53 = vmax.f32 %v4189_v50, 0.0 }
 0xa8e   : > { %v4198_v54 = vcombine.low %v4190_v51, %v4191_v52  ;;  %v4199_v55 = vcombine.low %v4192_v48, %v4193_v53 }
 0xa90   : > { %4202 = vst [vmem:[%s490_s22] sm:$0xff] %v4198_v54  ;;  %4205 = vst.msk [vmem:[%s490_s22 + $0x8] sm:$0xff] %vm4204_vm9, %v4199_v55 }
 0xa91   : > { %5038 = shalt.err (!%p5035_p11)
}
 0xa92   : > { %s5039_s2 = scalar_lea.hbm %s5974_s17, 256  ;;  %s5043_s12 = scalar_lea.hbm %s6028_s10, 512 }
 0xa93   : > { %p5040_p0 = scmp.ne.s32.totalorder %s5974_s17, %s5039_s2  ;;  %p5044_p9 = scmp.lt.u32.totalorder %s5974_s17, %s6028_s10 }
 0xa94   : > { %p5045_p4 = scmp.lt.u32.totalorder %s5043_s12, %s5039_s2  ;;  %p5047_p6 = scmp.lt.u32.totalorder %s5039_s2, %s5974_s17 }
 0xa95   : > { %p5041_p2 = pnand %p5040_p0, %p6076_p12 }
 0xa96   : > { %p5046_p5 = por %p5045_p4, %p5044_p9 }
 0xa97   : > { %p5042_p7 = pneg %p5041_p2 }
 0xa98   : > { %p5048_p13 = por %p5047_p6, %p5046_p5 }
 0xa9a   : > { %p5049_p8 = pnand %p5048_p13, %p5042_p7 }
 0xa9c   : > { %5052 = shalt.err (!%p5049_p8)
}
 0xa9d   : > { %4640 = dma.vmem_to_hbm [thread:$0]  (%p6076_p12), %s5976_s21, 256, %s5974_s17, %s4207_s19  }
 0xa9e PF: > { %s4233_s11 = sand.u32 1, %s5107_s13   ;;  %p6077_p1 = scmp.ne.s32.totalorder %s6051_s30, 0 }
 0xa9f   : > { %p6078_p10 = scmp.ge.s32.totalorder %s5119_s16, 2  ;;  %s4234_s28 = scalar_lea.sflag [#allocation5], %s4233_s11 }
 0xaa1   : > { %p4675_p3 = pnand %p6078_p10, %p6077_p1 }
 0xaa3   : > { %5102 = dma.done.wait (!%p4675_p3), %s4234_s28, 256  }
 0xaa4   : > { %5104 = vsyncadd (!%p4675_p3), %s4234_s28, 4294967040  ;;  %p29_p11 = scmp.ge.s32.totalorder %s5443_s23, 4   ;;  %s6079_s13 = smov %s5111_s14 }
 0xaa5   : > { %s6080_s14 = smov %s5115_s15  ;;  %s6081_s15 = smov %s5455_s18 }
 0xaa6   : > { %s6082_s16 = smov %s5443_s23  ;;  %31 = sbr.rel (!%p29_p11) target bundleno = 14 (0xe), region = 158 }
 0xaad   :  { %4239 = vsyncpa [#allocation4], 1 }
 0xaae   :  { %4241 = vsyncpa [#allocation4 + $0x1], 1 }
 0xaaf   :  { %4242 = vsyncpa [#allocation8], 1 }
 0xab0   :  { %4243 = vsyncpa [#allocation12], 1 }
 0xab1   :  { %4244 = vsyncpa [#allocation17], 1 }
 0xab2   :  { %4245 = vsyncpa [#allocation20], 1 }
 0xab3   :  { %4246 = vsyncpa [#allocation5], 1 }
 0xab4   :  { %4248 = vsyncpa [#allocation5 + $0x1], 1 }
 0xab5   :  { %4249 = vsyncpa [#allocation6], 1 }
 0xab6   :  { %4251 = vsyncpa [#allocation6 + $0x1], 1 }
 0xab7   :  { %4252 = vsyncpa [#allocation15], 1 }

</bundles_post_ra>
